<compile_context>
chip_gen: v6e
topology: v6e:2x2x1
jax: 0.10.0
libtpu: 0.0.40
codegen_flags: <defaults>
</compile_context>

<pallas_src>
from functools import partial

import jax
import jax.numpy as jnp
from jax import lax
from jax.experimental import pallas as pl
from jax.experimental.pallas import tpu as pltpu

LN_EPS = 1e-5
GELU_APPROX_TANH = False  # True -> jax.nn.gelu(approximate=True) (EUP), deviates from nn.GELU()


def _layer_norm(x, w, b):
    # Fused statistics: one pass for sum and sum-of-squares.
    mean = jnp.mean(x, axis=-1, keepdims=True)
    mean_sq = jnp.mean(x * x, axis=-1, keepdims=True)
    var = mean_sq - mean * mean
    return (x - mean) * lax.rsqrt(var + LN_EPS) * w + b


def _gelu(x):
    if GELU_APPROX_TANH:
        return jax.nn.gelu(x, approximate=True)
    # nn.GELU() default: exact erf-based GELU.
    return 0.5 * x * (1.0 + lax.erf(x * 0.7071067811865475))


def transformer_block_kernel(
    x_ref,                        # (Bt, Sc, D) f32
    p8_ref,                       # (8, D) f32: [ln1_w, ln1_b, ln2_w, ln2_b, b_o, b2, 0, 0]
    wqkv_ref,                     # (D, 3D) bf16  (pre-transposed)
    bqkv_ref,                     # (1, 3D) f32
    wo_ref,                       # (D, D)  bf16  (pre-transposed)
    w1_ref,                       # (D, M)  bf16  (pre-transposed)
    b1_ref,                       # (1, M)  f32
    w2_ref,                       # (M, D)  bf16  (pre-transposed)
    o_ref,                        # (Bt, Sc, D)
    heads_ref,                    # VMEM scratch (Bt*Sc, D) f32: concat-head buffer
    *, num_heads,
):
    x = x_ref[...]                                   # (Bt, Sc, D)
    Bt, Sc, D = x.shape
    H = num_heads
    Hd = D // H
    scale = float(Hd) ** -0.5
    cdt = jnp.bfloat16                               # MXU operand dtype

    ln1w = p8_ref[0]
    ln1b = p8_ref[1]
    ln2w = p8_ref[2]
    ln2b = p8_ref[3]
    b_o = p8_ref[4]
    b2 = p8_ref[5]

    xf = x.reshape(Bt * Sc, D).astype(jnp.float32)   # flatten batch rows

    # ---- LayerNorm 1 (f32) --------------------------------------------------
    xn = _layer_norm(xf, ln1w, ln1b)                 # (Bt*Sc, D)

    # ---- Fused QKV projection (one bf16 MXU contraction, f32 accumulate) ----
    qkv = jnp.dot(xn.astype(cdt), wqkv_ref[...],
                  preferred_element_type=jnp.float32) + bqkv_ref[0]
    q = qkv[:, :D].reshape(Bt, Sc, D)
    k = qkv[:, D:2 * D].reshape(Bt, Sc, D)
    v = qkv[:, 2 * D:].reshape(Bt, Sc, D)

    # ---- Per-head attention; heads written to scratch, W_o applied once -----
    for h in range(H):                               # static small loop
        lo, hi = h * Hd, (h + 1) * Hd
        qh = (q[:, :, lo:hi] * scale).astype(cdt)    # (Bt, Sc, Hd)
        kh = k[:, :, lo:hi].astype(cdt)
        vh = v[:, :, lo:hi].astype(cdt)
        # scores = qh @ kh^T, batched over Bt (no explicit transpose)
        scores = lax.dot_general(
            qh, kh, (((2,), (2,)), ((0,), (0,))),
            preferred_element_type=jnp.float32)      # (Bt, Sc, Sc) f32
        scores = scores - jnp.max(scores, axis=-1, keepdims=True)
        p = jnp.exp(scores)
        # Softmax denom via EUP reciprocal (approx) -- inference-grade accuracy.
        p = p * pl.reciprocal(jnp.sum(p, axis=-1, keepdims=True), approx=True)
        oh = lax.dot_general(
            p.astype(cdt), vh, (((2,), (1,)), ((0,), (0,))),
            preferred_element_type=jnp.float32)      # (Bt, Sc, Hd)
        heads_ref[:, lo:hi] = oh.reshape(Bt * Sc, Hd)

    # One full-K output projection instead of H skinny (K=Hd) matmuls.
    attn = jnp.dot(heads_ref[...].astype(cdt), wo_ref[...],
                   preferred_element_type=jnp.float32) + b_o

    x1 = xf + attn                                   # residual 1 (f32)

    # ---- LayerNorm 2 + MLP ---------------------------------------------------
    xn2 = _layer_norm(x1, ln2w, ln2b)
    h1 = jnp.dot(xn2.astype(cdt), w1_ref[...],
                 preferred_element_type=jnp.float32) + b1_ref[0]
    h1 = _gelu(h1)
    # dropout layers are identity (eval-mode forward)
    mlp = jnp.dot(h1.astype(cdt), w2_ref[...],
                  preferred_element_type=jnp.float32) + b2

    o_ref[...] = (x1 + mlp).reshape(Bt, Sc, D).astype(o_ref.dtype)


def _prep_params(params):
    """Wrapper-side one-time prep: transpose to (in, out), pack small params,
    cast matmul weights to bf16 (biases stay f32)."""
    f32, bf16 = jnp.float32, jnp.bfloat16
    D = params["w_o"].shape[0]
    pad = jnp.zeros((1, D), f32)
    p8 = jnp.concatenate(
        [params["ln1_w"], params["ln1_b"],
         params["ln2_w"], params["ln2_b"],
         params["b_o"], params["b2"], pad, pad], axis=0).astype(f32)
    return {
        "p8": p8,
        "wqkv_t": params["w_qkv"].T.astype(bf16),
        "b_qkv": params["b_qkv"].astype(f32),
        "wo_t": params["w_o"].T.astype(bf16),
        "w1_t": params["w1"].T.astype(bf16),
        "b1": params["b1"].astype(f32),
        "w2_t": params["w2"].T.astype(bf16),
    }


def _run_block(x, pt, num_heads, Bt, Sc):
    """One pallas_call covering all batch blocks and all Sc-length chunks."""
    B, S, D = x.shape
    assert B % Bt == 0 and S % Sc == 0
    nB, nC = B // Bt, S // Sc
    M = pt["w1_t"].shape[1]

    # VMEM footprint: bf16 weights (single-buffer target), f32 biases,
    # double-buffered x/out blocks, transient activations, head scratch.
    weight_b = 2 * (4 * D * D + 2 * D * M) + 4 * (11 * D + M)
    block_b = 2 * 2 * Bt * Sc * D * 4
    act_b = 4 * Bt * Sc * (10 * D + M + Sc) + 4 * Bt * Sc * D
    est = int(1.25 * (weight_b + block_b + act_b))
    # Clamp below the v7x 64 MiB physical VMEM per TensorCore.
    vmem_limit = max(32 * 1024 * 1024, min(est, 56 * 1024 * 1024))

    kernel = partial(transformer_block_kernel, num_heads=num_heads)
    out_shape = jax.ShapeDtypeStruct((B, S, D), x.dtype)

    def build(weight_mode):
        def const(shape):
            if weight_mode is None:
                return pl.BlockSpec(shape, lambda b, c: (0, 0))
            return pl.BlockSpec(shape, lambda b, c: (0, 0),
                                pipeline_mode=weight_mode)

        return pl.pallas_call(
            kernel,
            out_shape=out_shape,
            grid_spec=pltpu.PrefetchScalarGridSpec(
                num_scalar_prefetch=0,
                grid=(nB, nC),
                in_specs=[
                    pl.BlockSpec((Bt, Sc, D), lambda b, c: (b, c, 0)),  # x
                    const((8, D)),                                      # packed LN/bias params
                    const((D, 3 * D)), const((1, 3 * D)),               # qkv W^T, b
                    const((D, D)),                                      # out-proj W^T
                    const((D, M)), const((1, M)),                       # fc1 W^T, b
                    const((M, D)),                                      # fc2 W^T
                ],
                out_specs=pl.BlockSpec((Bt, Sc, D), lambda b, c: (b, c, 0)),
                scratch_shapes=[pltpu.VMEM((Bt * Sc, D), jnp.float32)],
            ),
            compiler_params=pltpu.CompilerParams(
                dimension_semantics=("parallel", "parallel"),
                vmem_limit_bytes=vmem_limit),
        )

    args = (x, pt["p8"], pt["wqkv_t"], pt["b_qkv"], pt["wo_t"],
            pt["w1_t"], pt["b1"], pt["w2_t"])
    try:
        # Constant-index weights never change block -> single buffer is enough;
        # halves their resident VMEM with zero DMA downside.
        return build(pl.Buffered(1))(*args)
    except Exception:
        # Fallback for jax versions without pipeline_mode support on TPU.
        return build(None)(*args)


def transformer_block(x, params, num_heads, max_seq=128):
    """Forward pass matching TransformerBlock.forward (eval mode)."""
    B, S, D = x.shape
    pt = _prep_params(params)

    # Largest divisor of B as the per-step batch block (fills the MXU M dim,
    # amortizes per-grid-step overhead).
    Bt = 1
    for cand in (16, 8, 4, 2, 1):
        if B % cand == 0:
            Bt = cand
            break

    if S <= max_seq:
        return _run_block(x, pt, num_heads, Bt, S)

    # Chunking path: full-size chunks handled by the grid in one call; a ragged
    # tail chunk (if any) gets its own call so attention masks nothing.
    n_full = (S // max_seq) * max_seq
    outs = [_run_block(x[:, :n_full], pt, num_heads, Bt, max_seq)]
    if n_full < S:
        outs.append(_run_block(x[:, n_full:], pt, num_heads, Bt, S - n_full))
    return outs[0] if len(outs) == 1 else jnp.concatenate(outs, axis=1)


# ------------------------------ test helpers ---------------------------------

def init_params(key, dim, num_heads, mlp_ratio=4):
    mlp_dim = int(dim * mlp_ratio)
    ks = jax.random.split(key, 6)
    f32 = jnp.float32
    return {
        "ln1_w": jnp.ones((1, dim), f32),
        "ln1_b": jnp.zeros((1, dim), f32),
        "w_qkv": 0.02 * jax.random.normal(ks[0], (3 * dim, dim), f32),
        "b_qkv": 0.01 * jax.random.normal(ks[1], (1, 3 * dim), f32),
        "w_o":   0.02 * jax.random.normal(ks[2], (dim, dim), f32),
        "b_o":   jnp.zeros((1, dim), f32),
        "ln2_w": jnp.ones((1, dim), f32),
        "ln2_b": jnp.zeros((1, dim), f32),
        "w1":    0.02 * jax.random.normal(ks[3], (mlp_dim, dim), f32),
        "b1":    0.01 * jax.random.normal(ks[4], (1, mlp_dim), f32),
        "w2":    0.02 * jax.random.normal(ks[5], (dim, mlp_dim), f32),
        "b2":    jnp.zeros((1, dim), f32),
    }


def _reference(x, params, num_heads, max_seq=128):
    """Pure-JAX f32 reference mirroring the PyTorch module (eval mode)."""
    def ln(y, w, b):
        mu = y.mean(-1, keepdims=True)
        var = ((y - mu) ** 2).mean(-1, keepdims=True)
        return (y - mu) / jnp.sqrt(var + LN_EPS) * w[0] + b[0]

    def block(c):
        B, S, D = c.shape
        H = num_heads
        Hd = D // H
        xn = ln(c, params["ln1_w"], params["ln1_b"])
        qkv = xn @ params["w_qkv"].T + params["b_qkv"][0]
        q, k, v = jnp.split(qkv, 3, axis=-1)
        q = q.reshape(B, S, H, Hd).transpose(0, 2, 1, 3)
        k = k.reshape(B, S, H, Hd).transpose(0, 2, 1, 3)
        v = v.reshape(B, S, H, Hd).transpose(0, 2, 1, 3)
        s = (q * (Hd ** -0.5)) @ k.transpose(0, 1, 3, 2)
        p = jax.nn.softmax(s, axis=-1)
        o = (p @ v).transpose(0, 2, 1, 3).reshape(B, S, D)
        c = c + (o @ params["w_o"].T + params["b_o"][0])
        xn2 = ln(c, params["ln2_w"], params["ln2_b"])
        h = xn2 @ params["w1"].T + params["b1"][0]
        h = 0.5 * h * (1.0 + lax.erf(h * 0.7071067811865475))
        return c + (h @ params["w2"].T + params["b2"][0])

    if x.shape[1] <= max_seq:
        return block(x)
    return jnp.concatenate(
        [block(x[:, i:i + max_seq]) for i in range(0, x.shape[1], max_seq)], axis=1)


if __name__ == "__main__":
    B, S, D = 2, 8, 32
    num_heads = 4

    key = jax.random.PRNGKey(0)
    k_x, k_p = jax.random.split(key)
    x = jax.random.normal(k_x, (B, S, D), jnp.float32)
    params = init_params(k_p, D, num_heads)

    out = transformer_block(x, params, num_heads)
    jax.block_until_ready(out)

    assert out.shape == (B, S, D)
    assert bool(jnp.all(jnp.isfinite(out)))

    # Loose tolerance: bf16 MXU operands + approx softmax reciprocal in kernel.
    ref = _reference(x, params, num_heads)
    max_err = float(jnp.max(jnp.abs(out.astype(jnp.float32) - ref)))
    assert max_err < 5e-2, f"max abs error {max_err}"

    print("KERNEL_OK")
</pallas_src>

<mosaic_0001>
module attributes {stable_mosaic.version = 11 : i64} {
  func.func @transformer_block_kernel(%arg0: i32, %arg1: i32, %arg2: memref<2x8x32xf32, #tpu.memory_space<vmem>>, %arg3: memref<8x32xf32, #tpu.memory_space<vmem>>, %arg4: memref<32x96xbf16, #tpu.memory_space<vmem>>, %arg5: memref<1x96xf32, #tpu.memory_space<vmem>>, %arg6: memref<32x32xbf16, #tpu.memory_space<vmem>>, %arg7: memref<32x128xbf16, #tpu.memory_space<vmem>>, %arg8: memref<1x128xf32, #tpu.memory_space<vmem>>, %arg9: memref<128x32xbf16, #tpu.memory_space<vmem>>, %arg10: memref<2x8x32xf32, #tpu.memory_space<vmem>>, %arg11: memref<16x32xf32, #tpu.memory_space<vmem>>) attributes {dimension_semantics = [#tpu.dimension_semantics<parallel>, #tpu.dimension_semantics<parallel>], iteration_bounds = array<i64: 1, 1>, scalar_prefetch = 0 : i64, scratch_operands = 1 : i64, tpu.core_type = #tpu.core_type<tc>, window_params = [{transform_indices = @transform_0, window_bounds = array<i64: 2, 8, 32>}, {pipeline_mode = #tpu.pipeline_mode<synchronous>, transform_indices = @transform_1, window_bounds = array<i64: 8, 32>}, {pipeline_mode = #tpu.pipeline_mode<synchronous>, transform_indices = @transform_2, window_bounds = array<i64: 32, 96>}, {pipeline_mode = #tpu.pipeline_mode<synchronous>, transform_indices = @transform_3, window_bounds = array<i64: 1, 96>}, {pipeline_mode = #tpu.pipeline_mode<synchronous>, transform_indices = @transform_4, window_bounds = array<i64: 32, 32>}, {pipeline_mode = #tpu.pipeline_mode<synchronous>, transform_indices = @transform_5, window_bounds = array<i64: 32, 128>}, {pipeline_mode = #tpu.pipeline_mode<synchronous>, transform_indices = @transform_6, window_bounds = array<i64: 1, 128>}, {pipeline_mode = #tpu.pipeline_mode<synchronous>, transform_indices = @transform_7, window_bounds = array<i64: 128, 32>}, {transform_indices = @transform_8, window_bounds = array<i64: 2, 8, 32>}]} {
    %c0 = arith.constant 0 : index
    %c0_0 = arith.constant 0 : index
    %c0_1 = arith.constant 0 : index
    %0 = vector.load %arg2[%c0, %c0_0, %c0_1] : memref<2x8x32xf32, #tpu.memory_space<vmem>>, vector<2x8x32xf32>
    %c0_2 = arith.constant 0 : index
    %c0_3 = arith.constant 0 : index
    %1 = vector.load %arg3[%c0_2, %c0_3] : memref<8x32xf32, #tpu.memory_space<vmem>>, vector<1x32xf32>
    %2 = vector.shape_cast %1 : vector<1x32xf32> to vector<32xf32>
    %c1 = arith.constant 1 : index
    %c0_4 = arith.constant 0 : index
    %3 = vector.load %arg3[%c1, %c0_4] : memref<8x32xf32, #tpu.memory_space<vmem>>, vector<1x32xf32>
    %4 = vector.shape_cast %3 : vector<1x32xf32> to vector<32xf32>
    %c2 = arith.constant 2 : index
    %c0_5 = arith.constant 0 : index
    %5 = vector.load %arg3[%c2, %c0_5] : memref<8x32xf32, #tpu.memory_space<vmem>>, vector<1x32xf32>
    %6 = vector.shape_cast %5 : vector<1x32xf32> to vector<32xf32>
    %c3 = arith.constant 3 : index
    %c0_6 = arith.constant 0 : index
    %7 = vector.load %arg3[%c3, %c0_6] : memref<8x32xf32, #tpu.memory_space<vmem>>, vector<1x32xf32>
    %8 = vector.shape_cast %7 : vector<1x32xf32> to vector<32xf32>
    %c4 = arith.constant 4 : index
    %c0_7 = arith.constant 0 : index
    %9 = vector.load %arg3[%c4, %c0_7] : memref<8x32xf32, #tpu.memory_space<vmem>>, vector<1x32xf32>
    %10 = vector.shape_cast %9 : vector<1x32xf32> to vector<32xf32>
    %c5 = arith.constant 5 : index
    %c0_8 = arith.constant 0 : index
    %11 = vector.load %arg3[%c5, %c0_8] : memref<8x32xf32, #tpu.memory_space<vmem>>, vector<1x32xf32>
    %12 = vector.shape_cast %11 : vector<1x32xf32> to vector<32xf32>
    %13 = vector.shape_cast %0 : vector<2x8x32xf32> to vector<16x32xf32>
    %cst = arith.constant dense<0.000000e+00> : vector<16xf32>
    %14 = vector.multi_reduction <add>, %13, %cst [1] : vector<16x32xf32> to vector<16xf32>
    %15 = vector.shape_cast %14 : vector<16xf32> to vector<16x1xf32>
    %cst_9 = arith.constant 3.200000e+01 : f32
    %16 = vector.broadcast %cst_9 : f32 to vector<16x1xf32>
    %17 = arith.divf %15, %16 : vector<16x1xf32>
    %18 = arith.mulf %13, %13 : vector<16x32xf32>
    %cst_10 = arith.constant dense<0.000000e+00> : vector<16xf32>
    %19 = vector.multi_reduction <add>, %18, %cst_10 [1] : vector<16x32xf32> to vector<16xf32>
    %20 = vector.shape_cast %19 : vector<16xf32> to vector<16x1xf32>
    %cst_11 = arith.constant 3.200000e+01 : f32
    %21 = vector.broadcast %cst_11 : f32 to vector<16x1xf32>
    %22 = arith.divf %20, %21 : vector<16x1xf32>
    %23 = arith.mulf %17, %17 : vector<16x1xf32>
    %24 = arith.subf %22, %23 : vector<16x1xf32>
    %25 = vector.broadcast %17 : vector<16x1xf32> to vector<16x32xf32>
    %26 = arith.subf %13, %25 : vector<16x32xf32>
    %cst_12 = arith.constant 9.99999974E-6 : f32
    %27 = vector.broadcast %cst_12 : f32 to vector<16x1xf32>
    %28 = arith.addf %24, %27 : vector<16x1xf32>
    %29 = math.rsqrt %28 : vector<16x1xf32>
    %30 = vector.broadcast %29 : vector<16x1xf32> to vector<16x32xf32>
    %31 = arith.mulf %26, %30 : vector<16x32xf32>
    %32 = vector.shape_cast %2 : vector<32xf32> to vector<1x32xf32>
    %33 = vector.broadcast %32 : vector<1x32xf32> to vector<16x32xf32>
    %34 = arith.mulf %31, %33 : vector<16x32xf32>
    %35 = vector.shape_cast %4 : vector<32xf32> to vector<1x32xf32>
    %36 = vector.broadcast %35 : vector<1x32xf32> to vector<16x32xf32>
    %37 = arith.addf %34, %36 : vector<16x32xf32>
    %38 = arith.truncf %37 : vector<16x32xf32> to vector<16x32xbf16>
    %c0_13 = arith.constant 0 : index
    %c0_14 = arith.constant 0 : index
    %39 = vector.load %arg4[%c0_13, %c0_14] : memref<32x96xbf16, #tpu.memory_space<vmem>>, vector<32x96xbf16>
    %cst_15 = arith.constant dense<0.000000e+00> : vector<16x96xf32>
    %40 = tpu.matmul %38, %39, %cst_15 {dimension_numbers = #tpu.dot_dimension_numbers<[1], [0], [0], [1], [0, 0, 1, 1], [], []>} : vector<16x32xbf16>, vector<32x96xbf16>, vector<16x96xf32> -> vector<16x96xf32>
    %c0_16 = arith.constant 0 : index
    %c0_17 = arith.constant 0 : index
    %41 = vector.load %arg5[%c0_16, %c0_17] : memref<1x96xf32, #tpu.memory_space<vmem>>, vector<1x96xf32>
    %42 = vector.shape_cast %41 : vector<1x96xf32> to vector<96xf32>
    %43 = vector.shape_cast %42 : vector<96xf32> to vector<1x96xf32>
    %44 = vector.broadcast %43 : vector<1x96xf32> to vector<16x96xf32>
    %45 = arith.addf %40, %44 : vector<16x96xf32>
    %46 = vector.extract_strided_slice %45 {offsets = [0, 0], sizes = [16, 32], strides = [1, 1]} : vector<16x96xf32> to vector<16x32xf32>
    %47 = vector.shape_cast %46 : vector<16x32xf32> to vector<2x8x32xf32>
    %48 = vector.extract_strided_slice %45 {offsets = [0, 32], sizes = [16, 32], strides = [1, 1]} : vector<16x96xf32> to vector<16x32xf32>
    %49 = vector.shape_cast %48 : vector<16x32xf32> to vector<2x8x32xf32>
    %50 = vector.extract_strided_slice %45 {offsets = [0, 64], sizes = [16, 32], strides = [1, 1]} : vector<16x96xf32> to vector<16x32xf32>
    %51 = vector.shape_cast %50 : vector<16x32xf32> to vector<2x8x32xf32>
    %52 = vector.extract_strided_slice %47 {offsets = [0, 0, 0], sizes = [2, 8, 8], strides = [1, 1, 1]} : vector<2x8x32xf32> to vector<2x8x8xf32>
    %cst_18 = arith.constant 0.353553385 : f32
    %53 = vector.broadcast %cst_18 : f32 to vector<2x8x8xf32>
    %54 = arith.mulf %52, %53 : vector<2x8x8xf32>
    %55 = arith.truncf %54 : vector<2x8x8xf32> to vector<2x8x8xbf16>
    %56 = vector.extract_strided_slice %49 {offsets = [0, 0, 0], sizes = [2, 8, 8], strides = [1, 1, 1]} : vector<2x8x32xf32> to vector<2x8x8xf32>
    %57 = arith.truncf %56 : vector<2x8x8xf32> to vector<2x8x8xbf16>
    %58 = vector.extract_strided_slice %51 {offsets = [0, 0, 0], sizes = [2, 8, 8], strides = [1, 1, 1]} : vector<2x8x32xf32> to vector<2x8x8xf32>
    %59 = arith.truncf %58 : vector<2x8x8xf32> to vector<2x8x8xbf16>
    %cst_19 = arith.constant dense<0.000000e+00> : vector<2x8x8xf32>
    %60 = tpu.matmul %55, %57, %cst_19 {dimension_numbers = #tpu.dot_dimension_numbers<[2], [2], [1], [1], [0, 0, 0, 1, 1, 1], [0], [0]>} : vector<2x8x8xbf16>, vector<2x8x8xbf16>, vector<2x8x8xf32> -> vector<2x8x8xf32>
    %cst_20 = arith.constant dense<0xFF800000> : vector<2x8xf32>
    %61 = vector.multi_reduction <maximumf>, %60, %cst_20 [2] : vector<2x8x8xf32> to vector<2x8xf32>
    %62 = vector.shape_cast %61 : vector<2x8xf32> to vector<2x8x1xf32>
    %63 = vector.broadcast %62 : vector<2x8x1xf32> to vector<2x8x8xf32>
    %64 = arith.subf %60, %63 : vector<2x8x8xf32>
    %65 = math.exp %64 : vector<2x8x8xf32>
    %cst_21 = arith.constant dense<0.000000e+00> : vector<2x8xf32>
    %66 = vector.multi_reduction <add>, %65, %cst_21 [2] : vector<2x8x8xf32> to vector<2x8xf32>
    %67 = vector.shape_cast %66 : vector<2x8xf32> to vector<2x8x1xf32>
    %68 = tpu.reciprocal %67 {approx = true} : vector<2x8x1xf32> -> vector<2x8x1xf32>
    %69 = vector.broadcast %68 : vector<2x8x1xf32> to vector<2x8x8xf32>
    %70 = arith.mulf %65, %69 : vector<2x8x8xf32>
    %71 = arith.truncf %70 : vector<2x8x8xf32> to vector<2x8x8xbf16>
    %cst_22 = arith.constant dense<0.000000e+00> : vector<2x8x8xf32>
    %72 = tpu.matmul %71, %59, %cst_22 {dimension_numbers = #tpu.dot_dimension_numbers<[2], [1], [1], [2], [0, 0, 0, 1, 1, 2], [0], [0]>} : vector<2x8x8xbf16>, vector<2x8x8xbf16>, vector<2x8x8xf32> -> vector<2x8x8xf32>
    %73 = vector.shape_cast %72 : vector<2x8x8xf32> to vector<16x8xf32>
    %c0_23 = arith.constant 0 : index
    %c0_24 = arith.constant 0 : index
    %74 = vector.load %arg11[%c0_23, %c0_24] : memref<16x32xf32, #tpu.memory_space<vmem>>, vector<16x8xf32>
    tpu.vector_store %arg11[%c0_23, %c0_24], %73 {strides = array<i32>} : memref<16x32xf32, #tpu.memory_space<vmem>>, vector<16x8xf32>,
    %75 = vector.extract_strided_slice %47 {offsets = [0, 0, 8], sizes = [2, 8, 8], strides = [1, 1, 1]} : vector<2x8x32xf32> to vector<2x8x8xf32>
    %cst_25 = arith.constant 0.353553385 : f32
    %76 = vector.broadcast %cst_25 : f32 to vector<2x8x8xf32>
    %77 = arith.mulf %75, %76 : vector<2x8x8xf32>
    %78 = arith.truncf %77 : vector<2x8x8xf32> to vector<2x8x8xbf16>
    %79 = vector.extract_strided_slice %49 {offsets = [0, 0, 8], sizes = [2, 8, 8], strides = [1, 1, 1]} : vector<2x8x32xf32> to vector<2x8x8xf32>
    %80 = arith.truncf %79 : vector<2x8x8xf32> to vector<2x8x8xbf16>
    %81 = vector.extract_strided_slice %51 {offsets = [0, 0, 8], sizes = [2, 8, 8], strides = [1, 1, 1]} : vector<2x8x32xf32> to vector<2x8x8xf32>
    %82 = arith.truncf %81 : vector<2x8x8xf32> to vector<2x8x8xbf16>
    %cst_26 = arith.constant dense<0.000000e+00> : vector<2x8x8xf32>
    %83 = tpu.matmul %78, %80, %cst_26 {dimension_numbers = #tpu.dot_dimension_numbers<[2], [2], [1], [1], [0, 0, 0, 1, 1, 1], [0], [0]>} : vector<2x8x8xbf16>, vector<2x8x8xbf16>, vector<2x8x8xf32> -> vector<2x8x8xf32>
    %cst_27 = arith.constant dense<0xFF800000> : vector<2x8xf32>
    %84 = vector.multi_reduction <maximumf>, %83, %cst_27 [2] : vector<2x8x8xf32> to vector<2x8xf32>
    %85 = vector.shape_cast %84 : vector<2x8xf32> to vector<2x8x1xf32>
    %86 = vector.broadcast %85 : vector<2x8x1xf32> to vector<2x8x8xf32>
    %87 = arith.subf %83, %86 : vector<2x8x8xf32>
    %88 = math.exp %87 : vector<2x8x8xf32>
    %cst_28 = arith.constant dense<0.000000e+00> : vector<2x8xf32>
    %89 = vector.multi_reduction <add>, %88, %cst_28 [2] : vector<2x8x8xf32> to vector<2x8xf32>
    %90 = vector.shape_cast %89 : vector<2x8xf32> to vector<2x8x1xf32>
    %91 = tpu.reciprocal %90 {approx = true} : vector<2x8x1xf32> -> vector<2x8x1xf32>
    %92 = vector.broadcast %91 : vector<2x8x1xf32> to vector<2x8x8xf32>
    %93 = arith.mulf %88, %92 : vector<2x8x8xf32>
    %94 = arith.truncf %93 : vector<2x8x8xf32> to vector<2x8x8xbf16>
    %cst_29 = arith.constant dense<0.000000e+00> : vector<2x8x8xf32>
    %95 = tpu.matmul %94, %82, %cst_29 {dimension_numbers = #tpu.dot_dimension_numbers<[2], [1], [1], [2], [0, 0, 0, 1, 1, 2], [0], [0]>} : vector<2x8x8xbf16>, vector<2x8x8xbf16>, vector<2x8x8xf32> -> vector<2x8x8xf32>
    %96 = vector.shape_cast %95 : vector<2x8x8xf32> to vector<16x8xf32>
    %c0_30 = arith.constant 0 : index
    %c8 = arith.constant 8 : index
    %97 = vector.load %arg11[%c0_30, %c8] : memref<16x32xf32, #tpu.memory_space<vmem>>, vector<16x8xf32>
    tpu.vector_store %arg11[%c0_30, %c8], %96 {strides = array<i32>} : memref<16x32xf32, #tpu.memory_space<vmem>>, vector<16x8xf32>,
    %98 = vector.extract_strided_slice %47 {offsets = [0, 0, 16], sizes = [2, 8, 8], strides = [1, 1, 1]} : vector<2x8x32xf32> to vector<2x8x8xf32>
    %cst_31 = arith.constant 0.353553385 : f32
    %99 = vector.broadcast %cst_31 : f32 to vector<2x8x8xf32>
    %100 = arith.mulf %98, %99 : vector<2x8x8xf32>
    %101 = arith.truncf %100 : vector<2x8x8xf32> to vector<2x8x8xbf16>
    %102 = vector.extract_strided_slice %49 {offsets = [0, 0, 16], sizes = [2, 8, 8], strides = [1, 1, 1]} : vector<2x8x32xf32> to vector<2x8x8xf32>
    %103 = arith.truncf %102 : vector<2x8x8xf32> to vector<2x8x8xbf16>
    %104 = vector.extract_strided_slice %51 {offsets = [0, 0, 16], sizes = [2, 8, 8], strides = [1, 1, 1]} : vector<2x8x32xf32> to vector<2x8x8xf32>
    %105 = arith.truncf %104 : vector<2x8x8xf32> to vector<2x8x8xbf16>
    %cst_32 = arith.constant dense<0.000000e+00> : vector<2x8x8xf32>
    %106 = tpu.matmul %101, %103, %cst_32 {dimension_numbers = #tpu.dot_dimension_numbers<[2], [2], [1], [1], [0, 0, 0, 1, 1, 1], [0], [0]>} : vector<2x8x8xbf16>, vector<2x8x8xbf16>, vector<2x8x8xf32> -> vector<2x8x8xf32>
    %cst_33 = arith.constant dense<0xFF800000> : vector<2x8xf32>
    %107 = vector.multi_reduction <maximumf>, %106, %cst_33 [2] : vector<2x8x8xf32> to vector<2x8xf32>
    %108 = vector.shape_cast %107 : vector<2x8xf32> to vector<2x8x1xf32>
    %109 = vector.broadcast %108 : vector<2x8x1xf32> to vector<2x8x8xf32>
    %110 = arith.subf %106, %109 : vector<2x8x8xf32>
    %111 = math.exp %110 : vector<2x8x8xf32>
    %cst_34 = arith.constant dense<0.000000e+00> : vector<2x8xf32>
    %112 = vector.multi_reduction <add>, %111, %cst_34 [2] : vector<2x8x8xf32> to vector<2x8xf32>
    %113 = vector.shape_cast %112 : vector<2x8xf32> to vector<2x8x1xf32>
    %114 = tpu.reciprocal %113 {approx = true} : vector<2x8x1xf32> -> vector<2x8x1xf32>
    %115 = vector.broadcast %114 : vector<2x8x1xf32> to vector<2x8x8xf32>
    %116 = arith.mulf %111, %115 : vector<2x8x8xf32>
    %117 = arith.truncf %116 : vector<2x8x8xf32> to vector<2x8x8xbf16>
    %cst_35 = arith.constant dense<0.000000e+00> : vector<2x8x8xf32>
    %118 = tpu.matmul %117, %105, %cst_35 {dimension_numbers = #tpu.dot_dimension_numbers<[2], [1], [1], [2], [0, 0, 0, 1, 1, 2], [0], [0]>} : vector<2x8x8xbf16>, vector<2x8x8xbf16>, vector<2x8x8xf32> -> vector<2x8x8xf32>
    %119 = vector.shape_cast %118 : vector<2x8x8xf32> to vector<16x8xf32>
    %c0_36 = arith.constant 0 : index
    %c16 = arith.constant 16 : index
    %120 = vector.load %arg11[%c0_36, %c16] : memref<16x32xf32, #tpu.memory_space<vmem>>, vector<16x8xf32>
    tpu.vector_store %arg11[%c0_36, %c16], %119 {strides = array<i32>} : memref<16x32xf32, #tpu.memory_space<vmem>>, vector<16x8xf32>,
    %121 = vector.extract_strided_slice %47 {offsets = [0, 0, 24], sizes = [2, 8, 8], strides = [1, 1, 1]} : vector<2x8x32xf32> to vector<2x8x8xf32>
    %cst_37 = arith.constant 0.353553385 : f32
    %122 = vector.broadcast %cst_37 : f32 to vector<2x8x8xf32>
    %123 = arith.mulf %121, %122 : vector<2x8x8xf32>
    %124 = arith.truncf %123 : vector<2x8x8xf32> to vector<2x8x8xbf16>
    %125 = vector.extract_strided_slice %49 {offsets = [0, 0, 24], sizes = [2, 8, 8], strides = [1, 1, 1]} : vector<2x8x32xf32> to vector<2x8x8xf32>
    %126 = arith.truncf %125 : vector<2x8x8xf32> to vector<2x8x8xbf16>
    %127 = vector.extract_strided_slice %51 {offsets = [0, 0, 24], sizes = [2, 8, 8], strides = [1, 1, 1]} : vector<2x8x32xf32> to vector<2x8x8xf32>
    %128 = arith.truncf %127 : vector<2x8x8xf32> to vector<2x8x8xbf16>
    %cst_38 = arith.constant dense<0.000000e+00> : vector<2x8x8xf32>
    %129 = tpu.matmul %124, %126, %cst_38 {dimension_numbers = #tpu.dot_dimension_numbers<[2], [2], [1], [1], [0, 0, 0, 1, 1, 1], [0], [0]>} : vector<2x8x8xbf16>, vector<2x8x8xbf16>, vector<2x8x8xf32> -> vector<2x8x8xf32>
    %cst_39 = arith.constant dense<0xFF800000> : vector<2x8xf32>
    %130 = vector.multi_reduction <maximumf>, %129, %cst_39 [2] : vector<2x8x8xf32> to vector<2x8xf32>
    %131 = vector.shape_cast %130 : vector<2x8xf32> to vector<2x8x1xf32>
    %132 = vector.broadcast %131 : vector<2x8x1xf32> to vector<2x8x8xf32>
    %133 = arith.subf %129, %132 : vector<2x8x8xf32>
    %134 = math.exp %133 : vector<2x8x8xf32>
    %cst_40 = arith.constant dense<0.000000e+00> : vector<2x8xf32>
    %135 = vector.multi_reduction <add>, %134, %cst_40 [2] : vector<2x8x8xf32> to vector<2x8xf32>
    %136 = vector.shape_cast %135 : vector<2x8xf32> to vector<2x8x1xf32>
    %137 = tpu.reciprocal %136 {approx = true} : vector<2x8x1xf32> -> vector<2x8x1xf32>
    %138 = vector.broadcast %137 : vector<2x8x1xf32> to vector<2x8x8xf32>
    %139 = arith.mulf %134, %138 : vector<2x8x8xf32>
    %140 = arith.truncf %139 : vector<2x8x8xf32> to vector<2x8x8xbf16>
    %cst_41 = arith.constant dense<0.000000e+00> : vector<2x8x8xf32>
    %141 = tpu.matmul %140, %128, %cst_41 {dimension_numbers = #tpu.dot_dimension_numbers<[2], [1], [1], [2], [0, 0, 0, 1, 1, 2], [0], [0]>} : vector<2x8x8xbf16>, vector<2x8x8xbf16>, vector<2x8x8xf32> -> vector<2x8x8xf32>
    %142 = vector.shape_cast %141 : vector<2x8x8xf32> to vector<16x8xf32>
    %c0_42 = arith.constant 0 : index
    %c24 = arith.constant 24 : index
    %143 = vector.load %arg11[%c0_42, %c24] : memref<16x32xf32, #tpu.memory_space<vmem>>, vector<16x8xf32>
    tpu.vector_store %arg11[%c0_42, %c24], %142 {strides = array<i32>} : memref<16x32xf32, #tpu.memory_space<vmem>>, vector<16x8xf32>,
    %c0_43 = arith.constant 0 : index
    %c0_44 = arith.constant 0 : index
    %144 = vector.load %arg11[%c0_43, %c0_44] : memref<16x32xf32, #tpu.memory_space<vmem>>, vector<16x32xf32>
    %145 = arith.truncf %144 : vector<16x32xf32> to vector<16x32xbf16>
    %c0_45 = arith.constant 0 : index
    %c0_46 = arith.constant 0 : index
    %146 = vector.load %arg6[%c0_45, %c0_46] : memref<32x32xbf16, #tpu.memory_space<vmem>>, vector<32x32xbf16>
    %cst_47 = arith.constant dense<0.000000e+00> : vector<16x32xf32>
    %147 = tpu.matmul %145, %146, %cst_47 {dimension_numbers = #tpu.dot_dimension_numbers<[1], [0], [0], [1], [0, 0, 1, 1], [], []>} : vector<16x32xbf16>, vector<32x32xbf16>, vector<16x32xf32> -> vector<16x32xf32>
    %148 = vector.shape_cast %10 : vector<32xf32> to vector<1x32xf32>
    %149 = vector.broadcast %148 : vector<1x32xf32> to vector<16x32xf32>
    %150 = arith.addf %147, %149 : vector<16x32xf32>
    %151 = arith.addf %13, %150 : vector<16x32xf32>
    %cst_48 = arith.constant dense<0.000000e+00> : vector<16xf32>
    %152 = vector.multi_reduction <add>, %151, %cst_48 [1] : vector<16x32xf32> to vector<16xf32>
    %153 = vector.shape_cast %152 : vector<16xf32> to vector<16x1xf32>
    %cst_49 = arith.constant 3.200000e+01 : f32
    %154 = vector.broadcast %cst_49 : f32 to vector<16x1xf32>
    %155 = arith.divf %153, %154 : vector<16x1xf32>
    %156 = arith.mulf %151, %151 : vector<16x32xf32>
    %cst_50 = arith.constant dense<0.000000e+00> : vector<16xf32>
    %157 = vector.multi_reduction <add>, %156, %cst_50 [1] : vector<16x32xf32> to vector<16xf32>
    %158 = vector.shape_cast %157 : vector<16xf32> to vector<16x1xf32>
    %cst_51 = arith.constant 3.200000e+01 : f32
    %159 = vector.broadcast %cst_51 : f32 to vector<16x1xf32>
    %160 = arith.divf %158, %159 : vector<16x1xf32>
    %161 = arith.mulf %155, %155 : vector<16x1xf32>
    %162 = arith.subf %160, %161 : vector<16x1xf32>
    %163 = vector.broadcast %155 : vector<16x1xf32> to vector<16x32xf32>
    %164 = arith.subf %151, %163 : vector<16x32xf32>
    %cst_52 = arith.constant 9.99999974E-6 : f32
    %165 = vector.broadcast %cst_52 : f32 to vector<16x1xf32>
    %166 = arith.addf %162, %165 : vector<16x1xf32>
    %167 = math.rsqrt %166 : vector<16x1xf32>
    %168 = vector.broadcast %167 : vector<16x1xf32> to vector<16x32xf32>
    %169 = arith.mulf %164, %168 : vector<16x32xf32>
    %170 = vector.shape_cast %6 : vector<32xf32> to vector<1x32xf32>
    %171 = vector.broadcast %170 : vector<1x32xf32> to vector<16x32xf32>
    %172 = arith.mulf %169, %171 : vector<16x32xf32>
    %173 = vector.shape_cast %8 : vector<32xf32> to vector<1x32xf32>
    %174 = vector.broadcast %173 : vector<1x32xf32> to vector<16x32xf32>
    %175 = arith.addf %172, %174 : vector<16x32xf32>
    %176 = arith.truncf %175 : vector<16x32xf32> to vector<16x32xbf16>
    %c0_53 = arith.constant 0 : index
    %c0_54 = arith.constant 0 : index
    %177 = vector.load %arg7[%c0_53, %c0_54] : memref<32x128xbf16, #tpu.memory_space<vmem>>, vector<32x128xbf16>
    %cst_55 = arith.constant dense<0.000000e+00> : vector<16x128xf32>
    %178 = tpu.matmul %176, %177, %cst_55 {dimension_numbers = #tpu.dot_dimension_numbers<[1], [0], [0], [1], [0, 0, 1, 1], [], []>} : vector<16x32xbf16>, vector<32x128xbf16>, vector<16x128xf32> -> vector<16x128xf32>
    %c0_56 = arith.constant 0 : index
    %c0_57 = arith.constant 0 : index
    %179 = vector.load %arg8[%c0_56, %c0_57] : memref<1x128xf32, #tpu.memory_space<vmem>>, vector<1x128xf32>
    %180 = vector.shape_cast %179 : vector<1x128xf32> to vector<128xf32>
    %181 = vector.shape_cast %180 : vector<128xf32> to vector<1x128xf32>
    %182 = vector.broadcast %181 : vector<1x128xf32> to vector<16x128xf32>
    %183 = arith.addf %178, %182 : vector<16x128xf32>
    %cst_58 = arith.constant 5.000000e-01 : f32
    %184 = vector.broadcast %cst_58 : f32 to vector<16x128xf32>
    %185 = arith.mulf %184, %183 : vector<16x128xf32>
    %cst_59 = arith.constant 0.707106769 : f32
    %186 = vector.broadcast %cst_59 : f32 to vector<16x128xf32>
    %187 = arith.mulf %183, %186 : vector<16x128xf32>
    %188 = math.erf %187 : vector<16x128xf32>
    %cst_60 = arith.constant 1.000000e+00 : f32
    %189 = vector.broadcast %cst_60 : f32 to vector<16x128xf32>
    %190 = arith.addf %189, %188 : vector<16x128xf32>
    %191 = arith.mulf %185, %190 : vector<16x128xf32>
    %192 = arith.truncf %191 : vector<16x128xf32> to vector<16x128xbf16>
    %c0_61 = arith.constant 0 : index
    %c0_62 = arith.constant 0 : index
    %193 = vector.load %arg9[%c0_61, %c0_62] : memref<128x32xbf16, #tpu.memory_space<vmem>>, vector<128x32xbf16>
    %cst_63 = arith.constant dense<0.000000e+00> : vector<16x32xf32>
    %194 = tpu.matmul %192, %193, %cst_63 {dimension_numbers = #tpu.dot_dimension_numbers<[1], [0], [0], [1], [0, 0, 1, 1], [], []>} : vector<16x128xbf16>, vector<128x32xbf16>, vector<16x32xf32> -> vector<16x32xf32>
    %195 = vector.shape_cast %12 : vector<32xf32> to vector<1x32xf32>
    %196 = vector.broadcast %195 : vector<1x32xf32> to vector<16x32xf32>
    %197 = arith.addf %194, %196 : vector<16x32xf32>
    %198 = arith.addf %151, %197 : vector<16x32xf32>
    %199 = vector.shape_cast %198 : vector<16x32xf32> to vector<2x8x32xf32>
    %c0_64 = arith.constant 0 : index
    %c0_65 = arith.constant 0 : index
    %c0_66 = arith.constant 0 : index
    %200 = vector.load %arg10[%c0_64, %c0_65, %c0_66] : memref<2x8x32xf32, #tpu.memory_space<vmem>>, vector<2x8x32xf32>
    tpu.vector_store %arg10[%c0_64, %c0_65, %c0_66], %199 {strides = array<i32>} : memref<2x8x32xf32, #tpu.memory_space<vmem>>, vector<2x8x32xf32>,
    return
  }
  func.func @transform_0(%arg0: i32, %arg1: i32) -> (i32, i32, i32) {
    %c0_i32 = arith.constant 0 : i32
    %c0_i32_0 = arith.constant 0 : i32
    return %arg0, %arg1, %c0_i32 : i32, i32, i32
  }
  func.func @transform_1(%arg0: i32, %arg1: i32) -> (i32, i32) {
    %c0_i32 = arith.constant 0 : i32
    %c0_i32_0 = arith.constant 0 : i32
    %c0_i32_1 = arith.constant 0 : i32
    return %c0_i32, %c0_i32_0 : i32, i32
  }
  func.func @transform_2(%arg0: i32, %arg1: i32) -> (i32, i32) {
    %c0_i32 = arith.constant 0 : i32
    %c0_i32_0 = arith.constant 0 : i32
    %c0_i32_1 = arith.constant 0 : i32
    return %c0_i32, %c0_i32_0 : i32, i32
  }
  func.func @transform_3(%arg0: i32, %arg1: i32) -> (i32, i32) {
    %c0_i32 = arith.constant 0 : i32
    %c0_i32_0 = arith.constant 0 : i32
    %c0_i32_1 = arith.constant 0 : i32
    return %c0_i32, %c0_i32_0 : i32, i32
  }
  func.func @transform_4(%arg0: i32, %arg1: i32) -> (i32, i32) {
    %c0_i32 = arith.constant 0 : i32
    %c0_i32_0 = arith.constant 0 : i32
    %c0_i32_1 = arith.constant 0 : i32
    return %c0_i32, %c0_i32_0 : i32, i32
  }
  func.func @transform_5(%arg0: i32, %arg1: i32) -> (i32, i32) {
    %c0_i32 = arith.constant 0 : i32
    %c0_i32_0 = arith.constant 0 : i32
    %c0_i32_1 = arith.constant 0 : i32
    return %c0_i32, %c0_i32_0 : i32, i32
  }
  func.func @transform_6(%arg0: i32, %arg1: i32) -> (i32, i32) {
    %c0_i32 = arith.constant 0 : i32
    %c0_i32_0 = arith.constant 0 : i32
    %c0_i32_1 = arith.constant 0 : i32
    return %c0_i32, %c0_i32_0 : i32, i32
  }
  func.func @transform_7(%arg0: i32, %arg1: i32) -> (i32, i32) {
    %c0_i32 = arith.constant 0 : i32
    %c0_i32_0 = arith.constant 0 : i32
    %c0_i32_1 = arith.constant 0 : i32
    return %c0_i32, %c0_i32_0 : i32, i32
  }
  func.func @transform_8(%arg0: i32, %arg1: i32) -> (i32, i32, i32) {
    %c0_i32 = arith.constant 0 : i32
    %c0_i32_0 = arith.constant 0 : i32
    return %arg0, %arg1, %c0_i32 : i32, i32, i32
  }
}

module attributes {stable_mosaic.version = 11 : i64} {
  func.func @transformer_block_kernel(%arg0: i32, %arg1: i32, %arg2: memref<2x8x32xf32, #tpu.memory_space<vmem>>, %arg3: memref<8x32xf32, #tpu.memory_space<vmem>>, %arg4: memref<32x96xbf16, #tpu.memory_space<vmem>>, %arg5: memref<1x96xf32, #tpu.memory_space<vmem>>, %arg6: memref<32x32xbf16, #tpu.memory_space<vmem>>, %arg7: memref<32x128xbf16, #tpu.memory_space<vmem>>, %arg8: memref<1x128xf32, #tpu.memory_space<vmem>>, %arg9: memref<128x32xbf16, #tpu.memory_space<vmem>>, %arg10: memref<2x8x32xf32, #tpu.memory_space<vmem>>, %arg11: memref<16x32xf32, #tpu.memory_space<vmem>>) attributes {dimension_semantics = [#tpu.dimension_semantics<parallel>, #tpu.dimension_semantics<parallel>], iteration_bounds = array<i64: 1, 1>, scalar_prefetch = 0 : i64, scratch_operands = 1 : i64, tpu.core_type = #tpu.core_type<tc>, window_params = [{transform_indices = @transform_0, window_bounds = array<i64: 2, 8, 32>}, {pipeline_mode = #tpu.pipeline_mode<synchronous>, transform_indices = @transform_1, window_bounds = array<i64: 8, 32>}, {pipeline_mode = #tpu.pipeline_mode<synchronous>, transform_indices = @transform_2, window_bounds = array<i64: 32, 96>}, {pipeline_mode = #tpu.pipeline_mode<synchronous>, transform_indices = @transform_3, window_bounds = array<i64: 1, 96>}, {pipeline_mode = #tpu.pipeline_mode<synchronous>, transform_indices = @transform_4, window_bounds = array<i64: 32, 32>}, {pipeline_mode = #tpu.pipeline_mode<synchronous>, transform_indices = @transform_5, window_bounds = array<i64: 32, 128>}, {pipeline_mode = #tpu.pipeline_mode<synchronous>, transform_indices = @transform_6, window_bounds = array<i64: 1, 128>}, {pipeline_mode = #tpu.pipeline_mode<synchronous>, transform_indices = @transform_7, window_bounds = array<i64: 128, 32>}, {transform_indices = @transform_8, window_bounds = array<i64: 2, 8, 32>}]} {
    %c0 = arith.constant 0 : index
    %c0_0 = arith.constant 0 : index
    %c0_1 = arith.constant 0 : index
    %0 = vector.load %arg2[%c0, %c0_0, %c0_1] : memref<2x8x32xf32, #tpu.memory_space<vmem>>, vector<2x8x32xf32>
    %c0_2 = arith.constant 0 : index
    %c0_3 = arith.constant 0 : index
    %1 = vector.load %arg3[%c0_2, %c0_3] : memref<8x32xf32, #tpu.memory_space<vmem>>, vector<1x32xf32>
    %2 = vector.shape_cast %1 : vector<1x32xf32> to vector<32xf32>
    %c1 = arith.constant 1 : index
    %c0_4 = arith.constant 0 : index
    %3 = vector.load %arg3[%c1, %c0_4] : memref<8x32xf32, #tpu.memory_space<vmem>>, vector<1x32xf32>
    %4 = vector.shape_cast %3 : vector<1x32xf32> to vector<32xf32>
    %c2 = arith.constant 2 : index
    %c0_5 = arith.constant 0 : index
    %5 = vector.load %arg3[%c2, %c0_5] : memref<8x32xf32, #tpu.memory_space<vmem>>, vector<1x32xf32>
    %6 = vector.shape_cast %5 : vector<1x32xf32> to vector<32xf32>
    %c3 = arith.constant 3 : index
    %c0_6 = arith.constant 0 : index
    %7 = vector.load %arg3[%c3, %c0_6] : memref<8x32xf32, #tpu.memory_space<vmem>>, vector<1x32xf32>
    %8 = vector.shape_cast %7 : vector<1x32xf32> to vector<32xf32>
    %c4 = arith.constant 4 : index
    %c0_7 = arith.constant 0 : index
    %9 = vector.load %arg3[%c4, %c0_7] : memref<8x32xf32, #tpu.memory_space<vmem>>, vector<1x32xf32>
    %10 = vector.shape_cast %9 : vector<1x32xf32> to vector<32xf32>
    %c5 = arith.constant 5 : index
    %c0_8 = arith.constant 0 : index
    %11 = vector.load %arg3[%c5, %c0_8] : memref<8x32xf32, #tpu.memory_space<vmem>>, vector<1x32xf32>
    %12 = vector.shape_cast %11 : vector<1x32xf32> to vector<32xf32>
    %13 = vector.shape_cast %0 : vector<2x8x32xf32> to vector<16x32xf32>
    %cst = arith.constant dense<0.000000e+00> : vector<16xf32>
    %14 = vector.multi_reduction <add>, %13, %cst [1] : vector<16x32xf32> to vector<16xf32>
    %15 = vector.shape_cast %14 : vector<16xf32> to vector<16x1xf32>
    %cst_9 = arith.constant 3.200000e+01 : f32
    %16 = vector.broadcast %cst_9 : f32 to vector<16x1xf32>
    %17 = arith.divf %15, %16 : vector<16x1xf32>
    %18 = arith.mulf %13, %13 : vector<16x32xf32>
    %cst_10 = arith.constant dense<0.000000e+00> : vector<16xf32>
    %19 = vector.multi_reduction <add>, %18, %cst_10 [1] : vector<16x32xf32> to vector<16xf32>
    %20 = vector.shape_cast %19 : vector<16xf32> to vector<16x1xf32>
    %cst_11 = arith.constant 3.200000e+01 : f32
    %21 = vector.broadcast %cst_11 : f32 to vector<16x1xf32>
    %22 = arith.divf %20, %21 : vector<16x1xf32>
    %23 = arith.mulf %17, %17 : vector<16x1xf32>
    %24 = arith.subf %22, %23 : vector<16x1xf32>
    %25 = vector.broadcast %17 : vector<16x1xf32> to vector<16x32xf32>
    %26 = arith.subf %13, %25 : vector<16x32xf32>
    %cst_12 = arith.constant 9.99999974E-6 : f32
    %27 = vector.broadcast %cst_12 : f32 to vector<16x1xf32>
    %28 = arith.addf %24, %27 : vector<16x1xf32>
    %29 = math.rsqrt %28 : vector<16x1xf32>
    %30 = vector.broadcast %29 : vector<16x1xf32> to vector<16x32xf32>
    %31 = arith.mulf %26, %30 : vector<16x32xf32>
    %32 = vector.shape_cast %2 : vector<32xf32> to vector<1x32xf32>
    %33 = vector.broadcast %32 : vector<1x32xf32> to vector<16x32xf32>
    %34 = arith.mulf %31, %33 : vector<16x32xf32>
    %35 = vector.shape_cast %4 : vector<32xf32> to vector<1x32xf32>
    %36 = vector.broadcast %35 : vector<1x32xf32> to vector<16x32xf32>
    %37 = arith.addf %34, %36 : vector<16x32xf32>
    %38 = arith.truncf %37 : vector<16x32xf32> to vector<16x32xbf16>
    %c0_13 = arith.constant 0 : index
    %c0_14 = arith.constant 0 : index
    %39 = vector.load %arg4[%c0_13, %c0_14] : memref<32x96xbf16, #tpu.memory_space<vmem>>, vector<32x96xbf16>
    %cst_15 = arith.constant dense<0.000000e+00> : vector<16x96xf32>
    %40 = tpu.matmul %38, %39, %cst_15 {dimension_numbers = #tpu.dot_dimension_numbers<[1], [0], [0], [1], [0, 0, 1, 1], [], []>} : vector<16x32xbf16>, vector<32x96xbf16>, vector<16x96xf32> -> vector<16x96xf32>
    %c0_16 = arith.constant 0 : index
    %c0_17 = arith.constant 0 : index
    %41 = vector.load %arg5[%c0_16, %c0_17] : memref<1x96xf32, #tpu.memory_space<vmem>>, vector<1x96xf32>
    %42 = vector.shape_cast %41 : vector<1x96xf32> to vector<96xf32>
    %43 = vector.shape_cast %42 : vector<96xf32> to vector<1x96xf32>
    %44 = vector.broadcast %43 : vector<1x96xf32> to vector<16x96xf32>
    %45 = arith.addf %40, %44 : vector<16x96xf32>
    %46 = vector.extract_strided_slice %45 {offsets = [0, 0], sizes = [16, 32], strides = [1, 1]} : vector<16x96xf32> to vector<16x32xf32>
    %47 = vector.shape_cast %46 : vector<16x32xf32> to vector<2x8x32xf32>
    %48 = vector.extract_strided_slice %45 {offsets = [0, 32], sizes = [16, 32], strides = [1, 1]} : vector<16x96xf32> to vector<16x32xf32>
    %49 = vector.shape_cast %48 : vector<16x32xf32> to vector<2x8x32xf32>
    %50 = vector.extract_strided_slice %45 {offsets = [0, 64], sizes = [16, 32], strides = [1, 1]} : vector<16x96xf32> to vector<16x32xf32>
    %51 = vector.shape_cast %50 : vector<16x32xf32> to vector<2x8x32xf32>
    %52 = vector.extract_strided_slice %47 {offsets = [0, 0, 0], sizes = [2, 8, 8], strides = [1, 1, 1]} : vector<2x8x32xf32> to vector<2x8x8xf32>
    %cst_18 = arith.constant 0.353553385 : f32
    %53 = vector.broadcast %cst_18 : f32 to vector<2x8x8xf32>
    %54 = arith.mulf %52, %53 : vector<2x8x8xf32>
    %55 = arith.truncf %54 : vector<2x8x8xf32> to vector<2x8x8xbf16>
    %56 = vector.extract_strided_slice %49 {offsets = [0, 0, 0], sizes = [2, 8, 8], strides = [1, 1, 1]} : vector<2x8x32xf32> to vector<2x8x8xf32>
    %57 = arith.truncf %56 : vector<2x8x8xf32> to vector<2x8x8xbf16>
    %58 = vector.extract_strided_slice %51 {offsets = [0, 0, 0], sizes = [2, 8, 8], strides = [1, 1, 1]} : vector<2x8x32xf32> to vector<2x8x8xf32>
    %59 = arith.truncf %58 : vector<2x8x8xf32> to vector<2x8x8xbf16>
    %cst_19 = arith.constant dense<0.000000e+00> : vector<2x8x8xf32>
    %60 = tpu.matmul %55, %57, %cst_19 {dimension_numbers = #tpu.dot_dimension_numbers<[2], [2], [1], [1], [0, 0, 0, 1, 1, 1], [0], [0]>} : vector<2x8x8xbf16>, vector<2x8x8xbf16>, vector<2x8x8xf32> -> vector<2x8x8xf32>
    %cst_20 = arith.constant dense<0xFF800000> : vector<2x8xf32>
    %61 = vector.multi_reduction <maximumf>, %60, %cst_20 [2] : vector<2x8x8xf32> to vector<2x8xf32>
    %62 = vector.shape_cast %61 : vector<2x8xf32> to vector<2x8x1xf32>
    %63 = vector.broadcast %62 : vector<2x8x1xf32> to vector<2x8x8xf32>
    %64 = arith.subf %60, %63 : vector<2x8x8xf32>
    %65 = math.exp %64 : vector<2x8x8xf32>
    %cst_21 = arith.constant dense<0.000000e+00> : vector<2x8xf32>
    %66 = vector.multi_reduction <add>, %65, %cst_21 [2] : vector<2x8x8xf32> to vector<2x8xf32>
    %67 = vector.shape_cast %66 : vector<2x8xf32> to vector<2x8x1xf32>
    %68 = tpu.reciprocal %67 {approx = true} : vector<2x8x1xf32> -> vector<2x8x1xf32>
    %69 = vector.broadcast %68 : vector<2x8x1xf32> to vector<2x8x8xf32>
    %70 = arith.mulf %65, %69 : vector<2x8x8xf32>
    %71 = arith.truncf %70 : vector<2x8x8xf32> to vector<2x8x8xbf16>
    %cst_22 = arith.constant dense<0.000000e+00> : vector<2x8x8xf32>
    %72 = tpu.matmul %71, %59, %cst_22 {dimension_numbers = #tpu.dot_dimension_numbers<[2], [1], [1], [2], [0, 0, 0, 1, 1, 2], [0], [0]>} : vector<2x8x8xbf16>, vector<2x8x8xbf16>, vector<2x8x8xf32> -> vector<2x8x8xf32>
    %73 = vector.shape_cast %72 : vector<2x8x8xf32> to vector<16x8xf32>
    %c0_23 = arith.constant 0 : index
    %c0_24 = arith.constant 0 : index
    %74 = vector.load %arg11[%c0_23, %c0_24] : memref<16x32xf32, #tpu.memory_space<vmem>>, vector<16x8xf32>
    tpu.vector_store %arg11[%c0_23, %c0_24], %73 {strides = array<i32>} : memref<16x32xf32, #tpu.memory_space<vmem>>, vector<16x8xf32>,
    %75 = vector.extract_strided_slice %47 {offsets = [0, 0, 8], sizes = [2, 8, 8], strides = [1, 1, 1]} : vector<2x8x32xf32> to vector<2x8x8xf32>
    %cst_25 = arith.constant 0.353553385 : f32
    %76 = vector.broadcast %cst_25 : f32 to vector<2x8x8xf32>
    %77 = arith.mulf %75, %76 : vector<2x8x8xf32>
    %78 = arith.truncf %77 : vector<2x8x8xf32> to vector<2x8x8xbf16>
    %79 = vector.extract_strided_slice %49 {offsets = [0, 0, 8], sizes = [2, 8, 8], strides = [1, 1, 1]} : vector<2x8x32xf32> to vector<2x8x8xf32>
    %80 = arith.truncf %79 : vector<2x8x8xf32> to vector<2x8x8xbf16>
    %81 = vector.extract_strided_slice %51 {offsets = [0, 0, 8], sizes = [2, 8, 8], strides = [1, 1, 1]} : vector<2x8x32xf32> to vector<2x8x8xf32>
    %82 = arith.truncf %81 : vector<2x8x8xf32> to vector<2x8x8xbf16>
    %cst_26 = arith.constant dense<0.000000e+00> : vector<2x8x8xf32>
    %83 = tpu.matmul %78, %80, %cst_26 {dimension_numbers = #tpu.dot_dimension_numbers<[2], [2], [1], [1], [0, 0, 0, 1, 1, 1], [0], [0]>} : vector<2x8x8xbf16>, vector<2x8x8xbf16>, vector<2x8x8xf32> -> vector<2x8x8xf32>
    %cst_27 = arith.constant dense<0xFF800000> : vector<2x8xf32>
    %84 = vector.multi_reduction <maximumf>, %83, %cst_27 [2] : vector<2x8x8xf32> to vector<2x8xf32>
    %85 = vector.shape_cast %84 : vector<2x8xf32> to vector<2x8x1xf32>
    %86 = vector.broadcast %85 : vector<2x8x1xf32> to vector<2x8x8xf32>
    %87 = arith.subf %83, %86 : vector<2x8x8xf32>
    %88 = math.exp %87 : vector<2x8x8xf32>
    %cst_28 = arith.constant dense<0.000000e+00> : vector<2x8xf32>
    %89 = vector.multi_reduction <add>, %88, %cst_28 [2] : vector<2x8x8xf32> to vector<2x8xf32>
    %90 = vector.shape_cast %89 : vector<2x8xf32> to vector<2x8x1xf32>
    %91 = tpu.reciprocal %90 {approx = true} : vector<2x8x1xf32> -> vector<2x8x1xf32>
    %92 = vector.broadcast %91 : vector<2x8x1xf32> to vector<2x8x8xf32>
    %93 = arith.mulf %88, %92 : vector<2x8x8xf32>
    %94 = arith.truncf %93 : vector<2x8x8xf32> to vector<2x8x8xbf16>
    %cst_29 = arith.constant dense<0.000000e+00> : vector<2x8x8xf32>
    %95 = tpu.matmul %94, %82, %cst_29 {dimension_numbers = #tpu.dot_dimension_numbers<[2], [1], [1], [2], [0, 0, 0, 1, 1, 2], [0], [0]>} : vector<2x8x8xbf16>, vector<2x8x8xbf16>, vector<2x8x8xf32> -> vector<2x8x8xf32>
    %96 = vector.shape_cast %95 : vector<2x8x8xf32> to vector<16x8xf32>
    %c0_30 = arith.constant 0 : index
    %c8 = arith.constant 8 : index
    %97 = vector.load %arg11[%c0_30, %c8] : memref<16x32xf32, #tpu.memory_space<vmem>>, vector<16x8xf32>
    tpu.vector_store %arg11[%c0_30, %c8], %96 {strides = array<i32>} : memref<16x32xf32, #tpu.memory_space<vmem>>, vector<16x8xf32>,
    %98 = vector.extract_strided_slice %47 {offsets = [0, 0, 16], sizes = [2, 8, 8], strides = [1, 1, 1]} : vector<2x8x32xf32> to vector<2x8x8xf32>
    %cst_31 = arith.constant 0.353553385 : f32
    %99 = vector.broadcast %cst_31 : f32 to vector<2x8x8xf32>
    %100 = arith.mulf %98, %99 : vector<2x8x8xf32>
    %101 = arith.truncf %100 : vector<2x8x8xf32> to vector<2x8x8xbf16>
    %102 = vector.extract_strided_slice %49 {offsets = [0, 0, 16], sizes = [2, 8, 8], strides = [1, 1, 1]} : vector<2x8x32xf32> to vector<2x8x8xf32>
    %103 = arith.truncf %102 : vector<2x8x8xf32> to vector<2x8x8xbf16>
    %104 = vector.extract_strided_slice %51 {offsets = [0, 0, 16], sizes = [2, 8, 8], strides = [1, 1, 1]} : vector<2x8x32xf32> to vector<2x8x8xf32>
    %105 = arith.truncf %104 : vector<2x8x8xf32> to vector<2x8x8xbf16>
    %cst_32 = arith.constant dense<0.000000e+00> : vector<2x8x8xf32>
    %106 = tpu.matmul %101, %103, %cst_32 {dimension_numbers = #tpu.dot_dimension_numbers<[2], [2], [1], [1], [0, 0, 0, 1, 1, 1], [0], [0]>} : vector<2x8x8xbf16>, vector<2x8x8xbf16>, vector<2x8x8xf32> -> vector<2x8x8xf32>
    %cst_33 = arith.constant dense<0xFF800000> : vector<2x8xf32>
    %107 = vector.multi_reduction <maximumf>, %106, %cst_33 [2] : vector<2x8x8xf32> to vector<2x8xf32>
    %108 = vector.shape_cast %107 : vector<2x8xf32> to vector<2x8x1xf32>
    %109 = vector.broadcast %108 : vector<2x8x1xf32> to vector<2x8x8xf32>
    %110 = arith.subf %106, %109 : vector<2x8x8xf32>
    %111 = math.exp %110 : vector<2x8x8xf32>
    %cst_34 = arith.constant dense<0.000000e+00> : vector<2x8xf32>
    %112 = vector.multi_reduction <add>, %111, %cst_34 [2] : vector<2x8x8xf32> to vector<2x8xf32>
    %113 = vector.shape_cast %112 : vector<2x8xf32> to vector<2x8x1xf32>
    %114 = tpu.reciprocal %113 {approx = true} : vector<2x8x1xf32> -> vector<2x8x1xf32>
    %115 = vector.broadcast %114 : vector<2x8x1xf32> to vector<2x8x8xf32>
    %116 = arith.mulf %111, %115 : vector<2x8x8xf32>
    %117 = arith.truncf %116 : vector<2x8x8xf32> to vector<2x8x8xbf16>
    %cst_35 = arith.constant dense<0.000000e+00> : vector<2x8x8xf32>
    %118 = tpu.matmul %117, %105, %cst_35 {dimension_numbers = #tpu.dot_dimension_numbers<[2], [1], [1], [2], [0, 0, 0, 1, 1, 2], [0], [0]>} : vector<2x8x8xbf16>, vector<2x8x8xbf16>, vector<2x8x8xf32> -> vector<2x8x8xf32>
    %119 = vector.shape_cast %118 : vector<2x8x8xf32> to vector<16x8xf32>
    %c0_36 = arith.constant 0 : index
    %c16 = arith.constant 16 : index
    %120 = vector.load %arg11[%c0_36, %c16] : memref<16x32xf32, #tpu.memory_space<vmem>>, vector<16x8xf32>
    tpu.vector_store %arg11[%c0_36, %c16], %119 {strides = array<i32>} : memref<16x32xf32, #tpu.memory_space<vmem>>, vector<16x8xf32>,
    %121 = vector.extract_strided_slice %47 {offsets = [0, 0, 24], sizes = [2, 8, 8], strides = [1, 1, 1]} : vector<2x8x32xf32> to vector<2x8x8xf32>
    %cst_37 = arith.constant 0.353553385 : f32
    %122 = vector.broadcast %cst_37 : f32 to vector<2x8x8xf32>
    %123 = arith.mulf %121, %122 : vector<2x8x8xf32>
    %124 = arith.truncf %123 : vector<2x8x8xf32> to vector<2x8x8xbf16>
    %125 = vector.extract_strided_slice %49 {offsets = [0, 0, 24], sizes = [2, 8, 8], strides = [1, 1, 1]} : vector<2x8x32xf32> to vector<2x8x8xf32>
    %126 = arith.truncf %125 : vector<2x8x8xf32> to vector<2x8x8xbf16>
    %127 = vector.extract_strided_slice %51 {offsets = [0, 0, 24], sizes = [2, 8, 8], strides = [1, 1, 1]} : vector<2x8x32xf32> to vector<2x8x8xf32>
    %128 = arith.truncf %127 : vector<2x8x8xf32> to vector<2x8x8xbf16>
    %cst_38 = arith.constant dense<0.000000e+00> : vector<2x8x8xf32>
    %129 = tpu.matmul %124, %126, %cst_38 {dimension_numbers = #tpu.dot_dimension_numbers<[2], [2], [1], [1], [0, 0, 0, 1, 1, 1], [0], [0]>} : vector<2x8x8xbf16>, vector<2x8x8xbf16>, vector<2x8x8xf32> -> vector<2x8x8xf32>
    %cst_39 = arith.constant dense<0xFF800000> : vector<2x8xf32>
    %130 = vector.multi_reduction <maximumf>, %129, %cst_39 [2] : vector<2x8x8xf32> to vector<2x8xf32>
    %131 = vector.shape_cast %130 : vector<2x8xf32> to vector<2x8x1xf32>
    %132 = vector.broadcast %131 : vector<2x8x1xf32> to vector<2x8x8xf32>
    %133 = arith.subf %129, %132 : vector<2x8x8xf32>
    %134 = math.exp %133 : vector<2x8x8xf32>
    %cst_40 = arith.constant dense<0.000000e+00> : vector<2x8xf32>
    %135 = vector.multi_reduction <add>, %134, %cst_40 [2] : vector<2x8x8xf32> to vector<2x8xf32>
    %136 = vector.shape_cast %135 : vector<2x8xf32> to vector<2x8x1xf32>
    %137 = tpu.reciprocal %136 {approx = true} : vector<2x8x1xf32> -> vector<2x8x1xf32>
    %138 = vector.broadcast %137 : vector<2x8x1xf32> to vector<2x8x8xf32>
    %139 = arith.mulf %134, %138 : vector<2x8x8xf32>
    %140 = arith.truncf %139 : vector<2x8x8xf32> to vector<2x8x8xbf16>
    %cst_41 = arith.constant dense<0.000000e+00> : vector<2x8x8xf32>
    %141 = tpu.matmul %140, %128, %cst_41 {dimension_numbers = #tpu.dot_dimension_numbers<[2], [1], [1], [2], [0, 0, 0, 1, 1, 2], [0], [0]>} : vector<2x8x8xbf16>, vector<2x8x8xbf16>, vector<2x8x8xf32> -> vector<2x8x8xf32>
    %142 = vector.shape_cast %141 : vector<2x8x8xf32> to vector<16x8xf32>
    %c0_42 = arith.constant 0 : index
    %c24 = arith.constant 24 : index
    %143 = vector.load %arg11[%c0_42, %c24] : memref<16x32xf32, #tpu.memory_space<vmem>>, vector<16x8xf32>
    tpu.vector_store %arg11[%c0_42, %c24], %142 {strides = array<i32>} : memref<16x32xf32, #tpu.memory_space<vmem>>, vector<16x8xf32>,
    %c0_43 = arith.constant 0 : index
    %c0_44 = arith.constant 0 : index
    %144 = vector.load %arg11[%c0_43, %c0_44] : memref<16x32xf32, #tpu.memory_space<vmem>>, vector<16x32xf32>
    %145 = arith.truncf %144 : vector<16x32xf32> to vector<16x32xbf16>
    %c0_45 = arith.constant 0 : index
    %c0_46 = arith.constant 0 : index
    %146 = vector.load %arg6[%c0_45, %c0_46] : memref<32x32xbf16, #tpu.memory_space<vmem>>, vector<32x32xbf16>
    %cst_47 = arith.constant dense<0.000000e+00> : vector<16x32xf32>
    %147 = tpu.matmul %145, %146, %cst_47 {dimension_numbers = #tpu.dot_dimension_numbers<[1], [0], [0], [1], [0, 0, 1, 1], [], []>} : vector<16x32xbf16>, vector<32x32xbf16>, vector<16x32xf32> -> vector<16x32xf32>
    %148 = vector.shape_cast %10 : vector<32xf32> to vector<1x32xf32>
    %149 = vector.broadcast %148 : vector<1x32xf32> to vector<16x32xf32>
    %150 = arith.addf %147, %149 : vector<16x32xf32>
    %151 = arith.addf %13, %150 : vector<16x32xf32>
    %cst_48 = arith.constant dense<0.000000e+00> : vector<16xf32>
    %152 = vector.multi_reduction <add>, %151, %cst_48 [1] : vector<16x32xf32> to vector<16xf32>
    %153 = vector.shape_cast %152 : vector<16xf32> to vector<16x1xf32>
    %cst_49 = arith.constant 3.200000e+01 : f32
    %154 = vector.broadcast %cst_49 : f32 to vector<16x1xf32>
    %155 = arith.divf %153, %154 : vector<16x1xf32>
    %156 = arith.mulf %151, %151 : vector<16x32xf32>
    %cst_50 = arith.constant dense<0.000000e+00> : vector<16xf32>
    %157 = vector.multi_reduction <add>, %156, %cst_50 [1] : vector<16x32xf32> to vector<16xf32>
    %158 = vector.shape_cast %157 : vector<16xf32> to vector<16x1xf32>
    %cst_51 = arith.constant 3.200000e+01 : f32
    %159 = vector.broadcast %cst_51 : f32 to vector<16x1xf32>
    %160 = arith.divf %158, %159 : vector<16x1xf32>
    %161 = arith.mulf %155, %155 : vector<16x1xf32>
    %162 = arith.subf %160, %161 : vector<16x1xf32>
    %163 = vector.broadcast %155 : vector<16x1xf32> to vector<16x32xf32>
    %164 = arith.subf %151, %163 : vector<16x32xf32>
    %cst_52 = arith.constant 9.99999974E-6 : f32
    %165 = vector.broadcast %cst_52 : f32 to vector<16x1xf32>
    %166 = arith.addf %162, %165 : vector<16x1xf32>
    %167 = math.rsqrt %166 : vector<16x1xf32>
    %168 = vector.broadcast %167 : vector<16x1xf32> to vector<16x32xf32>
    %169 = arith.mulf %164, %168 : vector<16x32xf32>
    %170 = vector.shape_cast %6 : vector<32xf32> to vector<1x32xf32>
    %171 = vector.broadcast %170 : vector<1x32xf32> to vector<16x32xf32>
    %172 = arith.mulf %169, %171 : vector<16x32xf32>
    %173 = vector.shape_cast %8 : vector<32xf32> to vector<1x32xf32>
    %174 = vector.broadcast %173 : vector<1x32xf32> to vector<16x32xf32>
    %175 = arith.addf %172, %174 : vector<16x32xf32>
    %176 = arith.truncf %175 : vector<16x32xf32> to vector<16x32xbf16>
    %c0_53 = arith.constant 0 : index
    %c0_54 = arith.constant 0 : index
    %177 = vector.load %arg7[%c0_53, %c0_54] : memref<32x128xbf16, #tpu.memory_space<vmem>>, vector<32x128xbf16>
    %cst_55 = arith.constant dense<0.000000e+00> : vector<16x128xf32>
    %178 = tpu.matmul %176, %177, %cst_55 {dimension_numbers = #tpu.dot_dimension_numbers<[1], [0], [0], [1], [0, 0, 1, 1], [], []>} : vector<16x32xbf16>, vector<32x128xbf16>, vector<16x128xf32> -> vector<16x128xf32>
    %c0_56 = arith.constant 0 : index
    %c0_57 = arith.constant 0 : index
    %179 = vector.load %arg8[%c0_56, %c0_57] : memref<1x128xf32, #tpu.memory_space<vmem>>, vector<1x128xf32>
    %180 = vector.shape_cast %179 : vector<1x128xf32> to vector<128xf32>
    %181 = vector.shape_cast %180 : vector<128xf32> to vector<1x128xf32>
    %182 = vector.broadcast %181 : vector<1x128xf32> to vector<16x128xf32>
    %183 = arith.addf %178, %182 : vector<16x128xf32>
    %cst_58 = arith.constant 5.000000e-01 : f32
    %184 = vector.broadcast %cst_58 : f32 to vector<16x128xf32>
    %185 = arith.mulf %184, %183 : vector<16x128xf32>
    %cst_59 = arith.constant 0.707106769 : f32
    %186 = vector.broadcast %cst_59 : f32 to vector<16x128xf32>
    %187 = arith.mulf %183, %186 : vector<16x128xf32>
    %188 = math.erf %187 : vector<16x128xf32>
    %cst_60 = arith.constant 1.000000e+00 : f32
    %189 = vector.broadcast %cst_60 : f32 to vector<16x128xf32>
    %190 = arith.addf %189, %188 : vector<16x128xf32>
    %191 = arith.mulf %185, %190 : vector<16x128xf32>
    %192 = arith.truncf %191 : vector<16x128xf32> to vector<16x128xbf16>
    %c0_61 = arith.constant 0 : index
    %c0_62 = arith.constant 0 : index
    %193 = vector.load %arg9[%c0_61, %c0_62] : memref<128x32xbf16, #tpu.memory_space<vmem>>, vector<128x32xbf16>
    %cst_63 = arith.constant dense<0.000000e+00> : vector<16x32xf32>
    %194 = tpu.matmul %192, %193, %cst_63 {dimension_numbers = #tpu.dot_dimension_numbers<[1], [0], [0], [1], [0, 0, 1, 1], [], []>} : vector<16x128xbf16>, vector<128x32xbf16>, vector<16x32xf32> -> vector<16x32xf32>
    %195 = vector.shape_cast %12 : vector<32xf32> to vector<1x32xf32>
    %196 = vector.broadcast %195 : vector<1x32xf32> to vector<16x32xf32>
    %197 = arith.addf %194, %196 : vector<16x32xf32>
    %198 = arith.addf %151, %197 : vector<16x32xf32>
    %199 = vector.shape_cast %198 : vector<16x32xf32> to vector<2x8x32xf32>
    %c0_64 = arith.constant 0 : index
    %c0_65 = arith.constant 0 : index
    %c0_66 = arith.constant 0 : index
    %200 = vector.load %arg10[%c0_64, %c0_65, %c0_66] : memref<2x8x32xf32, #tpu.memory_space<vmem>>, vector<2x8x32xf32>
    tpu.vector_store %arg10[%c0_64, %c0_65, %c0_66], %199 {strides = array<i32>} : memref<2x8x32xf32, #tpu.memory_space<vmem>>, vector<2x8x32xf32>,
    return
  }
  func.func @transform_0(%arg0: i32, %arg1: i32) -> (i32, i32, i32) {
    %c0_i32 = arith.constant 0 : i32
    %c0_i32_0 = arith.constant 0 : i32
    return %arg0, %arg1, %c0_i32 : i32, i32, i32
  }
  func.func @transform_1(%arg0: i32, %arg1: i32) -> (i32, i32) {
    %c0_i32 = arith.constant 0 : i32
    %c0_i32_0 = arith.constant 0 : i32
    %c0_i32_1 = arith.constant 0 : i32
    return %c0_i32, %c0_i32_0 : i32, i32
  }
  func.func @transform_2(%arg0: i32, %arg1: i32) -> (i32, i32) {
    %c0_i32 = arith.constant 0 : i32
    %c0_i32_0 = arith.constant 0 : i32
    %c0_i32_1 = arith.constant 0 : i32
    return %c0_i32, %c0_i32_0 : i32, i32
  }
  func.func @transform_3(%arg0: i32, %arg1: i32) -> (i32, i32) {
    %c0_i32 = arith.constant 0 : i32
    %c0_i32_0 = arith.constant 0 : i32
    %c0_i32_1 = arith.constant 0 : i32
    return %c0_i32, %c0_i32_0 : i32, i32
  }
  func.func @transform_4(%arg0: i32, %arg1: i32) -> (i32, i32) {
    %c0_i32 = arith.constant 0 : i32
    %c0_i32_0 = arith.constant 0 : i32
    %c0_i32_1 = arith.constant 0 : i32
    return %c0_i32, %c0_i32_0 : i32, i32
  }
  func.func @transform_5(%arg0: i32, %arg1: i32) -> (i32, i32) {
    %c0_i32 = arith.constant 0 : i32
    %c0_i32_0 = arith.constant 0 : i32
    %c0_i32_1 = arith.constant 0 : i32
    return %c0_i32, %c0_i32_0 : i32, i32
  }
  func.func @transform_6(%arg0: i32, %arg1: i32) -> (i32, i32) {
    %c0_i32 = arith.constant 0 : i32
    %c0_i32_0 = arith.constant 0 : i32
    %c0_i32_1 = arith.constant 0 : i32
    return %c0_i32, %c0_i32_0 : i32, i32
  }
  func.func @transform_7(%arg0: i32, %arg1: i32) -> (i32, i32) {
    %c0_i32 = arith.constant 0 : i32
    %c0_i32_0 = arith.constant 0 : i32
    %c0_i32_1 = arith.constant 0 : i32
    return %c0_i32, %c0_i32_0 : i32, i32
  }
  func.func @transform_8(%arg0: i32, %arg1: i32) -> (i32, i32, i32) {
    %c0_i32 = arith.constant 0 : i32
    %c0_i32_0 = arith.constant 0 : i32
    return %arg0, %arg1, %c0_i32 : i32, i32, i32
  }
}

</mosaic_0001>

<bundles_post_ra>
// kernel: tpu_custom_call.1
= control target key start
LH: loop header
LB: loop body
LE: loop exit
PB: predicated region body
PF: predicated region fallthrough
CT: control target
= control target key end

     0   :  { %vm39_vm0 = vcmask 261120   ;;  %s2066_s0 = inlined_call_operand.vmem [shape: f32[2,8,32], index: 0, kind: input, shape index: {}]   ;;  %s2067_s1 = inlined_call_operand.vmem [shape: f32[8,32], index: 1, kind: input, shape index: {}]   ;;  %s2068_s2 = inlined_call_operand.vmem [shape: bf16[32,96], index: 2, kind: input, shape index: {}]   ;;  %s2069_s3 = inlined_call_operand.vmem [shape: f32[1,96], index: 3, kind: input, shape index: {}]   ;;  %s2070_s4 = inlined_call_operand.vmem [shape: bf16[32,32], index: 4, kind: input, shape index: {}]   ;;  %s2071_s5 = inlined_call_operand.vmem [shape: bf16[32,128], index: 5, kind: input, shape index: {}]   ;;  %s2072_s6 = inlined_call_operand.vmem [shape: f32[1,128], index: 6, kind: input, shape index: {}]   ;;  %s2073_s7 = inlined_call_operand.vmem [shape: bf16[128,32], index: 7, kind: input, shape index: {}]   ;;  %s2074_s8 = inlined_call_operand.hbm [shape: f32[2,8,32], index: 8, kind: output, shape index: {}]  }
   0x1   :  { %v1788_v0 = vld [vmem:[%s2066_s0] sm:$0xff]  ;;  %v1793_v1 = vld [vmem:[%s2066_s0 + $0x8] sm:$0xff] }
   0x2   :  { %v40_v2 = vsel %vm39_vm0, %v1788_v0, 0.0  ;;  %v49_v3 = vmul.f32 %v1788_v0, %v1788_v0  ;;  %v43_v4 = vsel %vm39_vm0, %v1793_v1, 0.0  ;;  %v50_v5 = vmul.f32 %v1793_v1, %v1793_v1 }
   0x3   :  { %41 = vadd.xlane.f32.xlu0 %v40_v2 }
   0x4   :  { %v51_v6 = vsel %vm39_vm0, %v49_v3, 0.0  ;;  %v54_v7 = vsel %vm39_vm0, %v50_v5, 0.0 }
   0x5   :  { %52 = vadd.xlane.f32.xlu1 %v51_v6 }
   0x7   :  { %44 = vadd.xlane.f32.xlu0 %v43_v4 }
   0x9   :  { %55 = vadd.xlane.f32.xlu1 %v54_v7 }
   0xa   :  { %13 = vsyncpa [#allocation4], 0  ;;  %v1642_v8 = vld [vmem:[%s2068_s2 + $0x8] sm:$0xff]   ;;  %v1722_v9 = vmov 0.0   ;;  %vm1723_vm1 = vmmov 0   ;;  %v1643_v10 = vld [vmem:[%s2068_s2] sm:$0xff]  }
   0xb   :  { %1484 = vmatprep.subr.bf16.mxu0 %v1722_v9  ;;  %1488 = vmatprep.mubr.msk.bf16.mxu0 %vm1723_vm1, %v1722_v9  ;;  %v1393_v28 = vld [vmem:[%s2067_s1] ss:$0 sm:$0xff]  ;;  %v1394_v33 = vld [vmem:[%s2067_s1 + $0x1] ss:$0 sm:$0xff]  ;;  %s1724_s17 = smov 96   ;;  %vm160_vm2 = vcmask 64512  }
   0xc   :  { %1485 = vmatpush3.bf16.msra.mxu0 %v1642_v8  ;;  %1504 = vmatprep.subr.bf16.mxu1 %v1722_v9  ;;  %v1395_v38 = vld [vmem:[%s2069_s3] ss:$0 sm:$0xff]  ;;  %s1725_s3 = smov 64   ;;  %s1726_s18 = smov 88   ;;  %vm285_vm3 = vcmask 1043456   ;;  %vm609_vm4 = vcmask 130112  }
   0xd   :  { %1486 = vmatprep.subr.bf16.mxu0 %v1722_v9  ;;  %1506 = vmatprep.mubr.msk.bf16.mxu1 %vm1723_vm1, %v1722_v9  ;;  %s1727_s19 = smov 120   ;;  %s1728_s20 = smov 56   ;;  %vm840_vm5 = vcmask 195712   ;;  %vm1071_vm6 = vcmask 261312  }
   0xe   :  { %s1729_s21 = smov 80   ;;  %s1730_s22 = smov 112  }
   0xf   :  { %s1731_s23 = smov 48   ;;  %s1732_s24 = smov 72  }
  0x10   :  { %1487 = vmatpush3.bf16.msra.mxu0 %v1643_v10  ;;  %s1733_s25 = smov 104   ;;  %s1734_s26 = smov 40  }
  0x11   :  { %1492 = vmatprep.subr.bf16.mxu0 %v1722_v9  ;;  %s1735_s27 = smov 8   ;;  %s1736_s28 = smov 16  }
  0x12   :  { %s1737_s10 = smov 24   ;;  %s1738_s2 = smov [#allocation3]  }
  0x13   :  { %s1382_s12 = sshll.u32 %s1738_s2, 4  ;;  %s1383_s12 = int_to_ptr.vmem [resolvable:$true] %s1382_s12 }
  0x14   :  { %s1700_s13 = scalar_lea.vmem %s1383_s12, 256  ;;  %p1705_p1 = scmp.lt.s32.totalorder %s1383_s12, %s1383_s12 }
  0x15   :  { %p1701_p0 = scmp.ne.s32.totalorder %s1383_s12, %s1700_s13  ;;  %p1706_p2 = scmp.lt.s32.totalorder %s1700_s13, %s1700_s13 }
  0x17   :  { %p1707_p3 = por %p1706_p2, %p1705_p1 }
  0x19   :  { %p1708_p4 = pnand %p1707_p3, %p1701_p0 }
  0x8c   :  { %v42_v11 = vpop.xlane.xlu0 %41 }
  0x8d   :  { %v47_v12 = vmul.f32 0.03125, %v42_v11 }
  0x8e   :  { %v53_v13 = vpop.xlane.xlu1 %52 }
  0x8f   :  { %v59_v14 = vmul.f32 %v47_v12, %v47_v12  ;;  %v57_v15 = vmul.f32 0.03125, %v53_v13  ;;  %v63_v25 = vsub.f32 %v1788_v0, %v47_v12 }
  0x90   :  { %v45_v16 = vpop.xlane.xlu0 %44 }
  0x91   :  { %v61_v17 = vsub.f32 %v57_v15, %v59_v14  ;;  %v48_v18 = vmul.f32 0.03125, %v45_v16 }
  0x92   :  { %v56_v19 = vpop.xlane.xlu1 %55 }
  0x93   :  { %v65_v20 = vadd.f32 1e-05, %v61_v17  ;;  %v60_v21 = vmul.f32 %v48_v18, %v48_v18  ;;  %v58_v22 = vmul.f32 0.03125, %v56_v19  ;;  %v64_v29 = vsub.f32 %v1793_v1, %v48_v18 }
  0x95   :  { %1656 = vrsqrt.f32 %v65_v20  ;;  %v62_v23 = vsub.f32 %v58_v22, %v60_v21 }
  0x97   :  { %v66_v24 = vadd.f32 1e-05, %v62_v23 }
  0x99   :  { %1658 = vrsqrt.f32 %v66_v24 }
  0xa2   :  { %v1657_v26 = vpop.eup %1656 }
  0xa3   :  { %v69_v27 = vmul.f32 %v1657_v26, %v63_v25 }
  0xa5   :  { %v75_v32 = vmul.f32 %v1393_v28, %v69_v27 }
  0xa6   :  { %v1659_v30 = vpop.eup %1658 }
  0xa7   :  { %v70_v31 = vmul.f32 %v1659_v30, %v64_v29  ;;  %v81_v35 = vadd.f32 %v1394_v33, %v75_v32 }
  0xa9   :  { %v76_v34 = vmul.f32 %v1393_v28, %v70_v31 }
  0xab   :  { %v82_v36 = vadd.f32 %v1394_v33, %v76_v34 }
  0xad   :  { %v83_v37 = vpack.c.bf16 %v82_v36, %v81_v35 }
  0xaf   :  { %1489 = vmatmul.mubr.msk.bf16.vlgmr.msra.gmra.mxu0 %vm39_vm0, %v83_v37 }
  0xb0   :  { %1494 = vmatprep.mubr.msk.bf16.mxu0 %vm1723_vm1, %v1722_v9 }
 0x16f   :  { %v144_v39 = vpop.f32.mrf.mxu0 }
 0x170   :  { %v145_v40 = vadd.f32 %v1395_v38, %v144_v39 }
 0x171   :  { %v1490_v41 = vpop.f32.mrf.mxu0 }
 0x172   :  { %v1833_v42 = vpack.c.bf16 %v145_v40, %v145_v40  ;;  %v151_v49 = vmul.f32 0.35355338, %v145_v40 }
 0x173   :  { %v147_v43 = vpop.f32.mrf.mxu0 }
 0x174   :  { %v148_v44 = vadd.f32 %v1395_v38, %v147_v43  ;;  %158 = vrot.lane.b32.xlu0 %v1833_v42, %s1724_s17  ;;  %v1841_v51 = vpack.c.bf16 %v151_v49, %v151_v49 }
 0x175   :  { %v1491_v45 = vpop.f32.mrf.mxu0 }
 0x176   :  { %v1836_v46 = vpack.c.bf16 %v148_v44, %v148_v44  ;;  %v152_v53 = vmul.f32 0.35355338, %v148_v44 }
 0x178   :  { %208 = vrot.lane.b32.xlu1 %v1836_v46, %s1724_s17  ;;  %v1849_v54 = vpack.c.bf16 %v152_v53, %v152_v53 }
 0x1e6   :  { %v159_v47 = vpop.permute.xlu0 %158 }
 0x1e7   :  { %v165_v48 = vsel %vm160_vm2, %v159_v47, 0 }
 0x1e8   :  { %1493 = vmatpush3.bf16.xpose.msra.mxu0 %v165_v48 }
 0x1e9   :  { %1498 = vmatprep.subr.bf16.mxu0 %v1722_v9 }
 0x1ea   :  { %v209_v50 = vpop.permute.xlu1 %208 }
 0x1eb   :  { %v214_v52 = vsel %vm160_vm2, %v209_v50, 0 }
 0x1ef   :  { %1495 = vmatmul.mubr.msk.bf16.vlgmr.msra.gmra.mxu0 %vm160_vm2, %v1841_v51 }
 0x1f0   :  { %1499 = vmatpush3.bf16.xpose.msra.mxu0 %v214_v52  ;;  %1500 = vmatprep.mubr.msk.bf16.mxu0 %vm1723_vm1, %v1722_v9 }
 0x1f1   :  { %1510 = vmatprep.subr.bf16.mxu0 %v1722_v9 }
 0x1f7   :  { %1501 = vmatmul.mubr.msk.bf16.vlgmr.msra.gmra.mxu0 %vm160_vm2, %v1849_v54 }
 0x1f8   :  { %1512 = vmatprep.mubr.msk.bf16.mxu0 %vm1723_vm1, %v1722_v9 }
 0x2af   :  { %v201_v55 = vpop.f32.mrf.mxu0 }
 0x2b0   :  { %v256_v56 = vsel %vm160_vm2, %v201_v55, -inf }
 0x2b1   :  { %257 = vmax.xlane.f32.xlu1 %v256_v56  ;;  %v1496_v57 = vpop.f32.mrf.mxu0 }
 0x2b3   :  { %v204_v58 = vpop.f32.mrf.mxu0 }
 0x2b5   :  { %v1497_v59 = vpop.f32.mrf.mxu0 }
 0x2b7   :  { %v250_v60 = vpop.f32.mrf.mxu0 }
 0x2b8   :  { %v259_v61 = vsel %vm160_vm2, %v250_v60, -inf }
 0x2b9   :  { %260 = vmax.xlane.f32.xlu0 %v259_v61  ;;  %v1502_v62 = vpop.f32.mrf.mxu0 }
 0x2bb   :  { %v253_v63 = vpop.f32.mrf.mxu0 }
 0x2bd   :  { %v1503_v2 = vpop.f32.mrf.mxu0 }
 0x2c2   :  { %329 = vrot.lane.b32.xlu1 %v1836_v46, %s1725_s3 }
 0x2c6   :  { %382 = vrot.lane.b32.xlu1 %v1833_v42, %s1726_s18 }
 0x33a   :  { %v258_v3 = vpop.xlane.xlu1 %257 }
 0x33b   :  { %v262_v4 = vsub.f32 %v201_v55, %v258_v3 }
 0x33d   :  { %v264_v5 = vmul.f32 1.442695, %v262_v4 }
 0x33e   :  { %v330_v6 = vpop.permute.xlu1 %329 }
 0x33f   :  { %1660 = vpow2.f32 %v264_v5  ;;  %v335_v7 = vsel %vm285_vm3, %v330_v6, 0 }
 0x340   :  { %1511 = vmatpush3.bf16.msra.mxu0 %v335_v7 }
 0x341   :  { %1522 = vmatprep.subr.bf16.mxu0 %v1722_v9 }
 0x342   :  { %v261_v8 = vpop.xlane.xlu0 %260  ;;  %v383_v17 = vpop.permute.xlu1 %382 }
 0x343   :  { %v263_v10 = vsub.f32 %v250_v60, %v261_v8  ;;  %v388_v24 = vsel %vm160_vm2, %v383_v17, 0 }
 0x345   :  { %v266_v11 = vmul.f32 1.442695, %v263_v10 }
 0x347   :  { %1662 = vpow2.f32 %v266_v11 }
 0x34c   :  { %v1661_v12 = vpop.eup %1660 }
 0x34d   :  { %v268_v13 = vsel %vm160_vm2, %v1661_v12, 0.0 }
 0x34e   :  { %269 = vadd.xlane.f32.xlu0 %v268_v13 }
 0x354   :  { %v1663_v14 = vpop.eup %1662 }
 0x355   :  { %v271_v15 = vsel %vm160_vm2, %v1663_v14, 0.0 }
 0x356   :  { %272 = vadd.xlane.f32.xlu1 %v271_v15 }
 0x364   :  { %280 = vrot.lane.b32.xlu0 %v1833_v42, %s1725_s3 }
 0x367   :  { %433 = vrot.lane.b32.xlu1 %v1836_v46, %s1726_s18 }
 0x368   :  { %380 = vrot.lane.b32.xlu0 %v1841_v51, %s1727_s19 }
 0x36b   :  { %431 = vrot.lane.b32.xlu1 %v1849_v54, %s1727_s19 }
 0x3d7   :  { %v270_v16 = vpop.xlane.xlu0 %269 }
 0x3d8   :  { %1664 = vrcp.f32 %v270_v16 }
 0x3db   :  { %v281_v18 = vpop.permute.xlu0 %280 }
 0x3dc   :  { %v287_v19 = vsel %vm285_vm3, %v281_v18, 0 }
 0x3dd   :  { %1505 = vmatpush3.bf16.msra.mxu1 %v287_v19 }
 0x3de   :  { %1516 = vmatprep.subr.bf16.mxu1 %v1722_v9 }
 0x3df   :  { %v273_v20 = vpop.xlane.xlu1 %272  ;;  %v381_v29 = vpop.permute.xlu0 %380 }
 0x3e0   :  { %1666 = vrcp.f32 %v273_v20 }
 0x3e3   :  { %v434_v27 = vpop.permute.xlu1 %433 }
 0x3e4   :  { %v439_v30 = vsel %vm160_vm2, %v434_v27, 0 }
 0x3e5   :  { %v1665_v21 = vpop.eup %1664 }
 0x3e6   :  { %v276_v22 = vmul.f32 %v1665_v21, %v1661_v12 }
 0x3e7   :  { %v432_v31 = vpop.permute.xlu1 %431 }
 0x3e8   :  { %v278_v23 = vpack.c.bf16 %v276_v22, %v276_v22 }
 0x3ea   :  { %1507 = vmatmul.mubr.msk.bf16.vlgmr.msra.gmra.mxu1 %vm160_vm2, %v278_v23 }
 0x3eb   :  { %1517 = vmatpush3.bf16.xpose.msra.mxu1 %v388_v24  ;;  %1518 = vmatprep.mubr.msk.bf16.mxu1 %vm1723_vm1, %v1722_v9 }
 0x3ec   :  { %1528 = vmatprep.subr.bf16.mxu1 %v1722_v9 }
 0x3ed   :  { %v1667_v25 = vpop.eup %1666 }
 0x3ee   :  { %v277_v26 = vmul.f32 %v1667_v25, %v1663_v14 }
 0x3f0   :  { %v279_v28 = vpack.c.bf16 %v277_v26, %v277_v26 }
 0x3f2   :  { %1513 = vmatmul.mubr.msk.bf16.vlgmr.msra.gmra.mxu0 %vm160_vm2, %v279_v28  ;;  %1519 = vmatmul.mubr.msk.bf16.vlgmr.msra.gmra.mxu1 %vm160_vm2, %v381_v29 }
 0x3f3   :  { %1523 = vmatpush3.bf16.xpose.msra.mxu0 %v439_v30  ;;  %1524 = vmatprep.mubr.msk.bf16.mxu0 %vm1723_vm1, %v1722_v9 }
 0x3f4   :  { %1534 = vmatprep.subr.bf16.mxu0 %v1722_v9  ;;  %1530 = vmatprep.mubr.msk.bf16.mxu1 %vm1723_vm1, %v1722_v9 }
 0x3fa   :  { %1525 = vmatmul.mubr.msk.bf16.vlgmr.msra.gmra.mxu0 %vm160_vm2, %v432_v31 }
 0x3fb   :  { %1536 = vmatprep.mubr.msk.bf16.mxu0 %vm1723_vm1, %v1722_v9 }
 0x4aa   :  { %v323_v32 = vpop.f32.mrf.mxu1 }
 0x4ab   :  { %377 = vst.msk [vmem:[#allocation2] sm:$0xff] %vm160_vm2, %v323_v32 }
 0x4ac   :  { %v1508_v33 = vpop.f32.mrf.mxu1 }
 0x4ae   :  { %v326_v34 = vpop.f32.mrf.mxu1 }
 0x4b0   :  { %v1509_v35 = vpop.f32.mrf.mxu1 }
 0x4b2   :  { %v371_v36 = vpop.f32.mrf.mxu0  ;;  %v424_v37 = vpop.f32.mrf.mxu1 }
 0x4b3   :  { %378 = vst.msk [vmem:[#allocation2 + $0x8] sm:$0xff] %vm160_vm2, %v371_v36  ;;  %v481_v38 = vsel %vm160_vm2, %v424_v37, -inf }
 0x4b4   :  { %482 = vmax.xlane.f32.xlu0 %v481_v38  ;;  %v1514_v39 = vpop.f32.mrf.mxu0  ;;  %v1520_v40 = vpop.f32.mrf.mxu1 }
 0x4b6   :  { %v374_v41 = vpop.f32.mrf.mxu0  ;;  %v427_v43 = vpop.f32.mrf.mxu1 }
 0x4b8   :  { %v1515_v44 = vpop.f32.mrf.mxu0  ;;  %v1521_v45 = vpop.f32.mrf.mxu1 }
 0x4ba   :  { %v475_v47 = vpop.f32.mrf.mxu0 }
 0x4bb   :  { %v484_v48 = vsel %vm160_vm2, %v475_v47, -inf }
 0x4bc   :  { %485 = vmax.xlane.f32.xlu1 %v484_v48  ;;  %v1526_v49 = vpop.f32.mrf.mxu0 }
 0x4be   :  { %v478_v50 = vpop.f32.mrf.mxu0 }
 0x4c0   :  { %v1527_v52 = vpop.f32.mrf.mxu0 }
 0x4cd   :  { %553 = vrot.lane.b32.xlu1 %v1836_v46, %s1728_s20 }
 0x4d1   :  { %614 = vrot.lane.b32.xlu1 %v1833_v42, %s1729_s21 }
 0x4d5   :  { %664 = vrot.lane.b32.xlu1 %v1836_v46, %s1729_s21 }
 0x4d9   :  { %662 = vrot.lane.b32.xlu1 %v1849_v54, %s1730_s22 }
 0x53d   :  { %v483_v53 = vpop.xlane.xlu0 %482 }
 0x53e   :  { %v487_v55 = vsub.f32 %v424_v37, %v483_v53 }
 0x540   :  { %v489_v56 = vmul.f32 1.442695, %v487_v55 }
 0x542   :  { %1668 = vpow2.f32 %v489_v56 }
 0x545   :  { %v486_v57 = vpop.xlane.xlu1 %485 }
 0x546   :  { %v488_v58 = vsub.f32 %v475_v47, %v486_v57 }
 0x548   :  { %v491_v59 = vmul.f32 1.442695, %v488_v58 }
 0x549   :  { %v554_v60 = vpop.permute.xlu1 %553 }
 0x54a   :  { %1670 = vpow2.f32 %v491_v59  ;;  %v559_v61 = vsel %vm285_vm3, %v554_v60, 0 }
 0x54b   :  { %1535 = vmatpush3.bf16.msra.mxu0 %v559_v61 }
 0x54c   :  { %1546 = vmatprep.subr.bf16.mxu0 %v1722_v9 }
 0x54d   :  { %v615_v11 = vpop.permute.xlu1 %614 }
 0x54e   :  { %v620_v13 = vsel %vm160_vm2, %v615_v11, 0 }
 0x54f   :  { %v1669_v62 = vpop.eup %1668 }
 0x550   :  { %v493_v63 = vsel %vm160_vm2, %v1669_v62, 0.0 }
 0x551   :  { %494 = vadd.xlane.f32.xlu0 %v493_v63  ;;  %v665_v16 = vpop.permute.xlu1 %664 }
 0x552   :  { %v670_v19 = vsel %vm160_vm2, %v665_v16, 0 }
 0x555   :  { %v663_v20 = vpop.permute.xlu1 %662 }
 0x557   :  { %v1671_v2 = vpop.eup %1670 }
 0x558   :  { %v496_v3 = vsel %vm160_vm2, %v1671_v2, 0.0 }
 0x559   :  { %497 = vadd.xlane.f32.xlu0 %v496_v3 }
 0x56f   :  { %505 = vrot.lane.b32.xlu0 %v1833_v42, %s1728_s20 }
 0x573   :  { %612 = vrot.lane.b32.xlu0 %v1841_v51, %s1730_s22 }
 0x5da   :  { %v495_v4 = vpop.xlane.xlu0 %494 }
 0x5db   :  { %1672 = vrcp.f32 %v495_v4 }
 0x5e2   :  { %v498_v5 = vpop.xlane.xlu0 %497 }
 0x5e3   :  { %1674 = vrcp.f32 %v498_v5 }
 0x5e6   :  { %v506_v6 = vpop.permute.xlu0 %505 }
 0x5e7   :  { %v511_v7 = vsel %vm285_vm3, %v506_v6, 0 }
 0x5e8   :  { %v1673_v8 = vpop.eup %1672  ;;  %1529 = vmatpush3.bf16.msra.mxu1 %v511_v7 }
 0x5e9   :  { %1540 = vmatprep.subr.bf16.mxu1 %v1722_v9  ;;  %v501_v10 = vmul.f32 %v1673_v8, %v1669_v62 }
 0x5ea   :  { %v613_v18 = vpop.permute.xlu0 %612 }
 0x5eb   :  { %v503_v12 = vpack.c.bf16 %v501_v10, %v501_v10 }
 0x5ed   :  { %1531 = vmatmul.mubr.msk.bf16.vlgmr.msra.gmra.mxu1 %vm160_vm2, %v503_v12 }
 0x5ee   :  { %1541 = vmatpush3.bf16.xpose.msra.mxu1 %v620_v13  ;;  %1542 = vmatprep.mubr.msk.bf16.mxu1 %vm1723_vm1, %v1722_v9 }
 0x5ef   :  { %1552 = vmatprep.subr.bf16.mxu1 %v1722_v9 }
 0x5f0   :  { %v1675_v14 = vpop.eup %1674 }
 0x5f1   :  { %v502_v15 = vmul.f32 %v1675_v14, %v1671_v2 }
 0x5f3   :  { %v504_v17 = vpack.c.bf16 %v502_v15, %v502_v15 }
 0x5f5   :  { %1537 = vmatmul.mubr.msk.bf16.vlgmr.msra.gmra.mxu0 %vm160_vm2, %v504_v17  ;;  %1543 = vmatmul.mubr.msk.bf16.vlgmr.msra.gmra.mxu1 %vm160_vm2, %v613_v18 }
 0x5f6   :  { %1547 = vmatpush3.bf16.xpose.msra.mxu0 %v670_v19  ;;  %1548 = vmatprep.mubr.msk.bf16.mxu0 %vm1723_vm1, %v1722_v9 }
 0x5f7   :  { %1558 = vmatprep.subr.bf16.mxu0 %v1722_v9  ;;  %1554 = vmatprep.mubr.msk.bf16.mxu1 %vm1723_vm1, %v1722_v9 }
 0x5fd   :  { %1549 = vmatmul.mubr.msk.bf16.vlgmr.msra.gmra.mxu0 %vm160_vm2, %v663_v20 }
 0x5fe   :  { %1560 = vmatprep.mubr.msk.bf16.mxu0 %vm1723_vm1, %v1722_v9 }
 0x6ad   :  { %v1917_v21 = vpop.f32.mrf.mxu1 }
 0x6af   :  { %v1532_v22 = vpop.f32.mrf.mxu1 }
 0x6b1   :  { %v550_v23 = vpop.f32.mrf.mxu1 }
 0x6b3   :  { %v1533_v24 = vpop.f32.mrf.mxu1 }
 0x6b5   :  { %v1919_v25 = vpop.f32.mrf.mxu0  ;;  %v656_v26 = vpop.f32.mrf.mxu1 }
 0x6b6   :  { %v712_v27 = vsel %vm160_vm2, %v656_v26, -inf }
 0x6b7   :  { %713 = vmax.xlane.f32.xlu0 %v712_v27  ;;  %v1538_v28 = vpop.f32.mrf.mxu0  ;;  %v1544_v29 = vpop.f32.mrf.mxu1 }
 0x6b9   :  { %v598_v30 = vpop.f32.mrf.mxu0  ;;  %v659_v31 = vpop.f32.mrf.mxu1 }
 0x6bb   :  { %v1539_v32 = vpop.f32.mrf.mxu0  ;;  %v1545_v33 = vpop.f32.mrf.mxu1 }
 0x6bd   :  { %v706_v34 = vpop.f32.mrf.mxu0 }
 0x6be   :  { %v715_v35 = vsel %vm160_vm2, %v706_v34, -inf }
 0x6bf   :  { %716 = vmax.xlane.f32.xlu1 %v715_v35  ;;  %v1550_v36 = vpop.f32.mrf.mxu0 }
 0x6c1   :  { %v709_v37 = vpop.f32.mrf.mxu0 }
 0x6c3   :  { %v1551_v38 = vpop.f32.mrf.mxu0 }
 0x6d0   :  { %784 = vrot.lane.b32.xlu1 %v1836_v46, %s1731_s23 }
 0x6d4   :  { %845 = vrot.lane.b32.xlu1 %v1833_v42, %s1732_s24 }
 0x6d8   :  { %895 = vrot.lane.b32.xlu1 %v1836_v46, %s1732_s24 }
 0x6dc   :  { %893 = vrot.lane.b32.xlu1 %v1849_v54, %s1733_s25 }
 0x740   :  { %v714_v39 = vpop.xlane.xlu0 %713 }
 0x741   :  { %v718_v40 = vsub.f32 %v656_v26, %v714_v39 }
 0x743   :  { %v720_v41 = vmul.f32 1.442695, %v718_v40 }
 0x745   :  { %1676 = vpow2.f32 %v720_v41 }
 0x748   :  { %v717_v43 = vpop.xlane.xlu1 %716 }
 0x749   :  { %v719_v44 = vsub.f32 %v706_v34, %v717_v43 }
 0x74b   :  { %v722_v45 = vmul.f32 1.442695, %v719_v44 }
 0x74c   :  { %v785_v47 = vpop.permute.xlu1 %784 }
 0x74d   :  { %1678 = vpow2.f32 %v722_v45  ;;  %v790_v48 = vsel %vm285_vm3, %v785_v47, 0 }
 0x74e   :  { %1559 = vmatpush3.bf16.msra.mxu0 %v790_v48 }
 0x74f   :  { %1570 = vmatprep.subr.bf16.mxu0 %v1722_v9 }
 0x750   :  { %v846_v60 = vpop.permute.xlu1 %845 }
 0x751   :  { %v851_v62 = vsel %vm160_vm2, %v846_v60, 0 }
 0x752   :  { %v1677_v49 = vpop.eup %1676 }
 0x753   :  { %v724_v50 = vsel %vm160_vm2, %v1677_v49, 0.0 }
 0x754   :  { %725 = vadd.xlane.f32.xlu0 %v724_v50  ;;  %v896_v2 = vpop.permute.xlu1 %895 }
 0x755   :  { %v901_v5 = vsel %vm160_vm2, %v896_v2, 0 }
 0x758   :  { %v894_v6 = vpop.permute.xlu1 %893 }
 0x75a   :  { %v1679_v52 = vpop.eup %1678 }
 0x75b   :  { %v727_v54 = vsel %vm160_vm2, %v1679_v52, 0.0 }
 0x75c   :  { %728 = vadd.xlane.f32.xlu0 %v727_v54  ;;  %v1644_v54 = vld [vmem:[%s2070_s4 + $0x8] sm:$0xff]  }
 0x772   :  { %736 = vrot.lane.b32.xlu0 %v1833_v42, %s1731_s23 }
 0x776   :  { %843 = vrot.lane.b32.xlu0 %v1841_v51, %s1733_s25 }
 0x7dd   :  { %v726_v53 = vpop.xlane.xlu0 %725 }
 0x7de   :  { %1680 = vrcp.f32 %v726_v53  ;;  %v1645_v53 = vld [vmem:[%s2070_s4] sm:$0xff]  }
 0x7e5   :  { %v729_v55 = vpop.xlane.xlu0 %728 }
 0x7e6   :  { %1682 = vrcp.f32 %v729_v55 }
 0x7e9   :  { %v737_v56 = vpop.permute.xlu0 %736 }
 0x7ea   :  { %v742_v57 = vsel %vm285_vm3, %v737_v56, 0 }
 0x7eb   :  { %v1681_v58 = vpop.eup %1680  ;;  %1553 = vmatpush3.bf16.msra.mxu1 %v742_v57 }
 0x7ec   :  { %1564 = vmatprep.subr.bf16.mxu1 %v1722_v9  ;;  %v732_v59 = vmul.f32 %v1681_v58, %v1677_v49 }
 0x7ed   :  { %v844_v4 = vpop.permute.xlu0 %843 }
 0x7ee   :  { %v734_v61 = vpack.c.bf16 %v732_v59, %v732_v59 }
 0x7f0   :  { %1555 = vmatmul.mubr.msk.bf16.vlgmr.msra.gmra.mxu1 %vm160_vm2, %v734_v61 }
 0x7f1   :  { %1565 = vmatpush3.bf16.xpose.msra.mxu1 %v851_v62  ;;  %1566 = vmatprep.mubr.msk.bf16.mxu1 %vm1723_vm1, %v1722_v9 }
 0x7f2   :  { %1576 = vmatprep.subr.bf16.mxu1 %v1722_v9 }
 0x7f3   :  { %v1683_v51 = vpop.eup %1682 }
 0x7f4   :  { %v733_v63 = vmul.f32 %v1683_v51, %v1679_v52 }
 0x7f6   :  { %v735_v3 = vpack.c.bf16 %v733_v63, %v733_v63 }
 0x7f8   :  { %1561 = vmatmul.mubr.msk.bf16.vlgmr.msra.gmra.mxu0 %vm160_vm2, %v735_v3  ;;  %1567 = vmatmul.mubr.msk.bf16.vlgmr.msra.gmra.mxu1 %vm160_vm2, %v844_v4 }
 0x7f9   :  { %1571 = vmatpush3.bf16.xpose.msra.mxu0 %v901_v5  ;;  %1572 = vmatprep.mubr.msk.bf16.mxu0 %vm1723_vm1, %v1722_v9  ;;  %v1415_v5 = vld [vmem:[%s2067_s1 + $0x4] ss:$0 sm:$0xff] }
 0x7fa   :  { %1582 = vmatprep.subr.bf16.mxu0 %v1722_v9  ;;  %1578 = vmatprep.mubr.msk.bf16.mxu1 %vm1723_vm1, %v1722_v9 }
 0x800   :  { %1573 = vmatmul.mubr.msk.bf16.vlgmr.msra.gmra.mxu0 %vm160_vm2, %v894_v6 }
 0x801   :  { %1584 = vmatprep.mubr.msk.bf16.mxu0 %vm1723_vm1, %v1722_v9 }
 0x8b0   :  { %v778_v7 = vpop.f32.mrf.mxu1 }
 0x8b2   :  { %v1556_v8 = vpop.f32.mrf.mxu1 }
 0x8b4   :  { %v781_v10 = vpop.f32.mrf.mxu1 }
 0x8b6   :  { %v1557_v11 = vpop.f32.mrf.mxu1 }
 0x8b8   :  { %v826_v12 = vpop.f32.mrf.mxu0  ;;  %v887_v13 = vpop.f32.mrf.mxu1 }
 0x8b9   :  { %v943_v14 = vsel %vm160_vm2, %v887_v13, -inf }
 0x8ba   :  { %944 = vmax.xlane.f32.xlu0 %v943_v14  ;;  %v1562_v15 = vpop.f32.mrf.mxu0  ;;  %v1568_v16 = vpop.f32.mrf.mxu1 }
 0x8bc   :  { %v829_v17 = vpop.f32.mrf.mxu0  ;;  %v890_v18 = vpop.f32.mrf.mxu1 }
 0x8be   :  { %v1563_v19 = vpop.f32.mrf.mxu0  ;;  %v1569_v20 = vpop.f32.mrf.mxu1 }
 0x8bf   :  { %v1646_v20 = vld [vmem:[%s2071_s5 + $0x8] sm:$0xff]  }
 0x8c0   :  { %v937_v22 = vpop.f32.mrf.mxu0 }
 0x8c1   :  { %v946_v23 = vsel %vm160_vm2, %v937_v22, -inf }
 0x8c2   :  { %947 = vmax.xlane.f32.xlu1 %v946_v23  ;;  %v1574_v24 = vpop.f32.mrf.mxu0 }
 0x8c4   :  { %v940_v26 = vpop.f32.mrf.mxu0 }
 0x8c6   :  { %v1575_v27 = vpop.f32.mrf.mxu0 }
 0x8d3   :  { %1015 = vrot.lane.b32.xlu1 %v1836_v46, %s1734_s26 }
 0x8d7   :  { %603 = vrot.lane.b32.xlu1 %v1917_v21, %s1735_s27 }
 0x8db   :  { %605 = vrot.lane.b32.xlu1 %v1919_v25, %s1735_s27 }
 0x8df   :  { %836 = vrot.lane.b32.xlu1 %v826_v12, %s1736_s28 }
 0x943   :  { %v945_v28 = vpop.xlane.xlu0 %944 }
 0x944   :  { %v949_v29 = vsub.f32 %v887_v13, %v945_v28 }
 0x946   :  { %v951_v30 = vmul.f32 1.442695, %v949_v29 }
 0x948   :  { %1684 = vpow2.f32 %v951_v30 }
 0x94b   :  { %v948_v31 = vpop.xlane.xlu1 %947 }
 0x94c   :  { %v950_v32 = vsub.f32 %v937_v22, %v948_v31  ;;  %v1648_v22 = vld [vmem:[%s2073_s7 + $0x38] sm:$0xff]  }
 0x94e   :  { %v953_v33 = vmul.f32 1.442695, %v950_v32 }
 0x94f   :  { %v1016_v34 = vpop.permute.xlu1 %1015 }
 0x950   :  { %1686 = vpow2.f32 %v953_v33  ;;  %v1021_v46 = vsel %vm285_vm3, %v1016_v34, 0 }
 0x951   :  { %1583 = vmatpush3.bf16.msra.mxu0 %v1021_v46 }
 0x952   :  { %1596 = vmatprep.subr.bf16.mxu0 %v1722_v9 }
 0x953   :  { %v604_v21 = vpop.permute.xlu1 %603 }
 0x954   :  { %610 = vst.msk [vmem:[#allocation2] sm:$0xff] %vm609_vm4, %v604_v21 }
 0x955   :  { %v1685_v25 = vpop.eup %1684 }
 0x956   :  { %v955_v35 = vsel %vm160_vm2, %v1685_v25, 0.0 }
 0x957   :  { %956 = vadd.xlane.f32.xlu0 %v955_v35  ;;  %v606_v36 = vpop.permute.xlu1 %605 }
 0x958   :  { %611 = vst.msk [vmem:[#allocation2 + $0x8] sm:$0xff] %vm609_vm4, %v606_v36 }
 0x95b   :  { %v837_v37 = vpop.permute.xlu1 %836 }
 0x95c   :  { %842 = vst.msk [vmem:[#allocation2 + $0x8] sm:$0xff] %vm840_vm5, %v837_v37 }
 0x95d   :  { %v1687_v38 = vpop.eup %1686 }
 0x95e   :  { %v958_v39 = vsel %vm160_vm2, %v1687_v38, 0.0 }
 0x95f   :  { %959 = vadd.xlane.f32.xlu0 %v958_v39 }
 0x975   :  { %967 = vrot.lane.b32.xlu0 %v1833_v42, %s1734_s26 }
 0x979   :  { %834 = vrot.lane.b32.xlu0 %v778_v7, %s1736_s28 }
 0x9e0   :  { %v957_v40 = vpop.xlane.xlu0 %956 }
 0x9e1   :  { %1688 = vrcp.f32 %v957_v40 }
 0x9e8   :  { %v960_v41 = vpop.xlane.xlu0 %959 }
 0x9e9   :  { %1690 = vrcp.f32 %v960_v41 }
 0x9ec   :  { %v968_v43 = vpop.permute.xlu0 %967 }
 0x9ed   :  { %v973_v44 = vsel %vm285_vm3, %v968_v43, 0 }
 0x9ee   :  { %v1689_v45 = vpop.eup %1688  ;;  %1577 = vmatpush3.bf16.msra.mxu1 %v973_v44  ;;  %v1420_v44 = vld [vmem:[%s2067_s1 + $0x3] ss:$0 sm:$0xff] }
 0x9ef   :  { %v963_v47 = vmul.f32 %v1689_v45, %v1685_v25  ;;  %1588 = vmatprep.subr.bf16.mxu1 %v1722_v9 }
 0x9f0   :  { %v835_v48 = vpop.permute.xlu0 %834 }
 0x9f1   :  { %841 = vst.msk [vmem:[#allocation2] sm:$0xff] %vm840_vm5, %v835_v48  ;;  %v965_v49 = vpack.c.bf16 %v963_v47, %v963_v47 }
 0x9f3   :  { %1579 = vmatmul.mubr.msk.bf16.vlgmr.msra.gmra.mxu1 %vm160_vm2, %v965_v49 }
 0x9f4   :  { %1592 = vmatprep.mubr.msk.bf16.mxu1 %vm1723_vm1, %v1722_v9  ;;  %1589 = vmatpush3.bf16.msra.mxu1 %v1644_v54  ;;  %v1652_v54 = vld [vmem:[%s2073_s7 + $0x18] sm:$0xff]  }
 0x9f5   :  { %1590 = vmatprep.subr.bf16.mxu1 %v1722_v9 }
 0x9f6   :  { %v1691_v42 = vpop.eup %1690 }
 0x9f7   :  { %v964_v50 = vmul.f32 %v1691_v42, %v1687_v38  ;;  %v1419_v38 = vld [vmem:[%s2067_s1 + $0x2] ss:$0 sm:$0xff]  ;;  %v1649_v42 = vld [vmem:[%s2073_s7 + $0x30] sm:$0xff]  }
 0x9f8   :  { %1591 = vmatpush3.bf16.msra.mxu1 %v1645_v53  ;;  %v1653_v53 = vld [vmem:[%s2073_s7 + $0x10] sm:$0xff]  }
 0x9f9   :  { %v966_v52 = vpack.c.bf16 %v964_v50, %v964_v50  ;;  %1604 = vmatprep.subr.bf16.mxu1 %v1722_v9  ;;  %v1650_v50 = vld [vmem:[%s2073_s7 + $0x28] sm:$0xff]  }
 0x9fb   :  { %1585 = vmatmul.mubr.msk.bf16.vlgmr.msra.gmra.mxu0 %vm160_vm2, %v966_v52  ;;  %v1651_v52 = vld [vmem:[%s2073_s7 + $0x20] sm:$0xff]  }
 0x9fc   :  { %1600 = vmatprep.mubr.msk.bf16.mxu0 %vm1723_vm1, %v1722_v9  ;;  %1597 = vmatpush3.bf16.msra.mxu0 %v1646_v20 }
 0x9fd   :  { %1598 = vmatprep.subr.bf16.mxu0 %v1722_v9 }
 0xab3   :  { %v1009_v55 = vpop.f32.mrf.mxu1 }
 0xab4   :  { %1065 = vrot.lane.b32.xlu0 %v1009_v55, %s1737_s10  ;;  %v1654_v55 = vld [vmem:[%s2073_s7 + $0x8] sm:$0xff]  }
 0xab5   :  { %v1580_v56 = vpop.f32.mrf.mxu1 }
 0xab6   :  { %v1655_v56 = vld [vmem:[%s2073_s7] sm:$0xff]  }
 0xab7   :  { %v1012_v57 = vpop.f32.mrf.mxu1 }
 0xab8   :  { %v1421_v57 = vld [vmem:[%s2072_s6] ss:$0 sm:$0xff] }
 0xab9   :  { %v1581_v58 = vpop.f32.mrf.mxu1 }
 0xabb   :  { %v1057_v59 = vpop.f32.mrf.mxu0 }
 0xabc   :  { %1067 = vrot.lane.b32.xlu1 %v1057_v59, %s1737_s10 }
 0xabd   :  { %v1586_v60 = vpop.f32.mrf.mxu0 }
 0xabf   :  { %v1060_v61 = vpop.f32.mrf.mxu0 }
 0xac1   :  { %v1587_v62 = vpop.f32.mrf.mxu0 }
 0xb26   :  { %v1066_v51 = vpop.permute.xlu0 %1065 }
 0xb27   :  { %1072 = vst.msk [vmem:[#allocation2] sm:$0xff] %vm1071_vm6, %v1066_v51 }
 0xb2e   :  { %v1068_v63 = vpop.permute.xlu1 %1067  ;;  %v1074_v2 = vld [vmem:[#allocation2] sm:$0xff] }
 0xb2f   :  { %1073 = vst.msk [vmem:[#allocation2 + $0x8] sm:$0xff] %vm1071_vm6, %v1068_v63 }
 0xb36   :  { %v1075_v3 = vld [vmem:[#allocation2 + $0x8] sm:$0xff] }
 0xb37   :  { %v1076_v4 = vpack.c.bf16 %v1075_v3, %v1074_v2 }
 0xb39   :  { %1593 = vmatmul.mubr.msk.bf16.vlgmr.msra.gmra.mxu1 %vm39_vm0, %v1076_v4 }
 0xb3a   :  { %1620 = vmatprep.mubr.msk.bf16.mxu1 %vm1723_vm1, %v1722_v9  ;;  %1605 = vmatpush3.bf16.msra.mxu1 %v1648_v22 }
 0xb3b   :  { %1606 = vmatprep.subr.bf16.mxu1 %v1722_v9 }
 0xb3e   :  { %1607 = vmatpush3.bf16.msra.mxu1 %v1649_v42 }
 0xb3f   :  { %1608 = vmatprep.subr.bf16.mxu1 %v1722_v9 }
 0xb42   :  { %1609 = vmatpush3.bf16.msra.mxu1 %v1650_v50 }
 0xb43   :  { %1610 = vmatprep.subr.bf16.mxu1 %v1722_v9 }
 0xb46   :  { %1611 = vmatpush3.bf16.msra.mxu1 %v1651_v52 }
 0xb47   :  { %1612 = vmatprep.subr.bf16.mxu1 %v1722_v9 }
 0xb4a   :  { %1613 = vmatpush3.bf16.msra.mxu1 %v1652_v54 }
 0xb4b   :  { %1614 = vmatprep.subr.bf16.mxu1 %v1722_v9 }
 0xb4e   :  { %1615 = vmatpush3.bf16.msra.mxu1 %v1653_v53 }
 0xb4f   :  { %1616 = vmatprep.subr.bf16.mxu1 %v1722_v9 }
 0xb52   :  { %1617 = vmatpush3.bf16.msra.mxu1 %v1654_v55 }
 0xb53   :  { %1618 = vmatprep.subr.bf16.mxu1 %v1722_v9 }
 0xb56   :  { %1619 = vmatpush3.bf16.msra.mxu1 %v1655_v56 }
 0xbf9   :  { %v1134_v6 = vpop.f32.mrf.mxu1 }
 0xbfa   :  { %v1135_v7 = vadd.f32 %v1415_v5, %v1134_v6 }
 0xbfb   :  { %v1594_v8 = vpop.f32.mrf.mxu1 }
 0xbfc   :  { %v1990_v10 = vadd.f32 %v1135_v7, %v1788_v0 }
 0xbfd   :  { %v1137_v11 = vpop.f32.mrf.mxu1 }
 0xbfe   :  { %v1138_v12 = vadd.f32 %v1415_v5, %v1137_v11  ;;  %v1143_v13 = vsel %vm39_vm0, %v1990_v10, 0.0  ;;  %v1151_v14 = vmul.f32 %v1990_v10, %v1990_v10 }
 0xbff   :  { %1144 = vadd.xlane.f32.xlu0 %v1143_v13  ;;  %v1595_v15 = vpop.f32.mrf.mxu1  ;;  %v1425_v13 = vld [vmem:[%s2067_s1 + $0x5] ss:$0 sm:$0xff] }
 0xc00   :  { %v1997_v16 = vadd.f32 %v1138_v12, %v1793_v1  ;;  %v1153_v17 = vsel %vm39_vm0, %v1151_v14, 0.0  ;;  %v1647_v1 = vld [vmem:[%s2071_s5] sm:$0xff]  }
 0xc01   :  { %1599 = vmatpush3.bf16.msra.mxu0 %v1647_v1 }
 0xc02   :  { %v1146_v18 = vsel %vm39_vm0, %v1997_v16, 0.0  ;;  %v1152_v0 = vmul.f32 %v1997_v16, %v1997_v16 }
 0xc03   :  { %1154 = vadd.xlane.f32.xlu0 %v1153_v17  ;;  %1147 = vadd.xlane.f32.xlu1 %v1146_v18 }
 0xc04   :  { %v1156_v19 = vsel %vm39_vm0, %v1152_v0, 0.0 }
 0xc07   :  { %1157 = vadd.xlane.f32.xlu0 %v1156_v19 }
 0xc88   :  { %v1145_v23 = vpop.xlane.xlu0 %1144 }
 0xc89   :  { %v1149_v24 = vmul.f32 0.03125, %v1145_v23 }
 0xc8b   :  { %v1161_v28 = vmul.f32 %v1149_v24, %v1149_v24  ;;  %v1165_v35 = vsub.f32 %v1990_v10, %v1149_v24 }
 0xc8c   :  { %v1155_v26 = vpop.xlane.xlu0 %1154  ;;  %v1148_v27 = vpop.xlane.xlu1 %1147 }
 0xc8d   :  { %v1159_v29 = vmul.f32 0.03125, %v1155_v26  ;;  %v1150_v30 = vmul.f32 0.03125, %v1148_v27 }
 0xc8f   :  { %v1163_v31 = vsub.f32 %v1159_v29, %v1161_v28  ;;  %v1162_v34 = vmul.f32 %v1150_v30, %v1150_v30  ;;  %v1166_v39 = vsub.f32 %v1997_v16, %v1150_v30 }
 0xc90   :  { %v1158_v32 = vpop.xlane.xlu0 %1157 }
 0xc91   :  { %v1167_v33 = vadd.f32 1e-05, %v1163_v31  ;;  %v1160_v46 = vmul.f32 0.03125, %v1158_v32 }
 0xc93   :  { %1692 = vrsqrt.f32 %v1167_v33  ;;  %v1164_v21 = vsub.f32 %v1160_v46, %v1162_v34 }
 0xc95   :  { %v1168_v25 = vadd.f32 1e-05, %v1164_v21 }
 0xc97   :  { %1694 = vrsqrt.f32 %v1168_v25 }
 0xca0   :  { %v1693_v36 = vpop.eup %1692 }
 0xca1   :  { %v1171_v37 = vmul.f32 %v1693_v36, %v1165_v35 }
 0xca3   :  { %v1177_v43 = vmul.f32 %v1419_v38, %v1171_v37 }
 0xca4   :  { %v1695_v40 = vpop.eup %1694 }
 0xca5   :  { %v1172_v41 = vmul.f32 %v1695_v40, %v1166_v39  ;;  %v1183_v47 = vadd.f32 %v1420_v44, %v1177_v43 }
 0xca7   :  { %v1178_v45 = vmul.f32 %v1419_v38, %v1172_v41 }
 0xca9   :  { %v1184_v48 = vadd.f32 %v1420_v44, %v1178_v45 }
 0xcab   :  { %v1185_v49 = vpack.c.bf16 %v1184_v48, %v1183_v47 }
 0xcad   :  { %1601 = vmatmul.mubr.msk.bf16.vlgmr.msra.gmra.mxu0 %vm39_vm0, %v1185_v49 }
 0xd6d   :  { %v1246_v58 = vpop.f32.mrf.mxu0 }
 0xd6e   :  { %v1247_v59 = vadd.f32 %v1421_v57, %v1246_v58 }
 0xd6f   :  { %v1602_v60 = vpop.f32.mrf.mxu0 }
 0xd70   :  { %v1255_v61 = vmul.f32 0.70710677, %v1247_v59  ;;  %v1253_v5 = vmul.f32 0.5, %v1247_v59 }
 0xd71   :  { %v1249_v62 = vpop.f32.mrf.mxu0 }
 0xd72   :  { %1696 = verf.f32 %v1255_v61  ;;  %v1250_v51 = vadd.f32 %v1421_v57, %v1249_v62 }
 0xd73   :  { %v1603_v63 = vpop.f32.mrf.mxu0 }
 0xd74   :  { %v1256_v2 = vmul.f32 0.70710677, %v1250_v51  ;;  %v1254_v6 = vmul.f32 0.5, %v1250_v51 }
 0xd76   :  { %1698 = verf.f32 %v1256_v2 }
 0xd7f   :  { %v1697_v9 = vpop.eup %1696 }
 0xd80   :  { %v1259_v3 = vadd.f32 1.0, %v1697_v9 }
 0xd82   :  { %v1261_v8 = vmul.f32 %v1259_v3, %v1253_v5 }
 0xd83   :  { %v1699_v4 = vpop.eup %1698 }
 0xd84   :  { %v1260_v7 = vadd.f32 1.0, %v1699_v4 }
 0xd86   :  { %v1262_v11 = vmul.f32 %v1260_v7, %v1254_v6 }
 0xd88   :  { %v1263_v12 = vpack.c.bf16 %v1262_v11, %v1261_v8 }
 0xd8a   :  { %1621 = vmatmul.mubr.bf16.vlgmr.msra.gmra.mxu1 %v1263_v12 }
 0xe4a   :  { %v1366_v14 = vpop.f32.mrf.mxu1 }
 0xe4b   :  { %v1367_v15 = vadd.f32 %v1425_v13, %v1366_v14 }
 0xe4c   :  { %v1622_v17 = vpop.f32.mrf.mxu1 }
 0xe4d   :  { %v1373_v18 = vadd.f32 %v1367_v15, %v1990_v10 }
 0xe4e   :  { %v1369_v0 = vpop.f32.mrf.mxu1 }
 0xe4f   :  { %1375 = vst.msk [vmem:[#allocation3] sm:$0xff] %vm39_vm0, %v1373_v18  ;;  %v1370_v19 = vadd.f32 %v1425_v13, %v1369_v0 }
 0xe50   :  { %v1623_v20 = vpop.f32.mrf.mxu1 }
 0xe51   :  { %v1374_v1 = vadd.f32 %v1370_v19, %v1997_v16 }
 0xe53   :  { %1376 = vst.msk [vmem:[#allocation3 + $0x8] sm:$0xff] %vm39_vm0, %v1374_v1 }
 0xe54   :  { %1711 = shalt.err (!%p1708_p4)
}
 0xe55   :  { %s1739_s1 = smov 128  }
 0xe56   :  { %1388 = dma.vmem_to_hbm [thread:$0]  %s1383_s12, 256, %s2074_s8, [#allocation4], %s1739_s1, %s1739_s1, %s1735_s27  }
 0xe57   :  { %1720 = dma.done.wait [#allocation4], 256  }
 0xe58   :  { %1721 = vsyncadd [#allocation4], 4294967040 }
 0xe59   :  { %1392 = vsyncpa [#allocation4], 1 }

// kernel: tpu_custom_call.1
= control target key start
LH: loop header
LB: loop body
LE: loop exit
PB: predicated region body
PF: predicated region fallthrough
CT: control target
= control target key end

     0   :  { %vm39_vm0 = vcmask 261120   ;;  %s2066_s0 = inlined_call_operand.vmem [shape: f32[2,8,32], index: 0, kind: input, shape index: {}]   ;;  %s2067_s1 = inlined_call_operand.vmem [shape: f32[8,32], index: 1, kind: input, shape index: {}]   ;;  %s2068_s2 = inlined_call_operand.vmem [shape: bf16[32,96], index: 2, kind: input, shape index: {}]   ;;  %s2069_s3 = inlined_call_operand.vmem [shape: f32[1,96], index: 3, kind: input, shape index: {}]   ;;  %s2070_s4 = inlined_call_operand.vmem [shape: bf16[32,32], index: 4, kind: input, shape index: {}]   ;;  %s2071_s5 = inlined_call_operand.vmem [shape: bf16[32,128], index: 5, kind: input, shape index: {}]   ;;  %s2072_s6 = inlined_call_operand.vmem [shape: f32[1,128], index: 6, kind: input, shape index: {}]   ;;  %s2073_s7 = inlined_call_operand.vmem [shape: bf16[128,32], index: 7, kind: input, shape index: {}]   ;;  %s2074_s8 = inlined_call_operand.hbm [shape: f32[2,8,32], index: 8, kind: output, shape index: {}]  }
   0x1   :  { %v1788_v0 = vld [vmem:[%s2066_s0] sm:$0xff]  ;;  %v1793_v1 = vld [vmem:[%s2066_s0 + $0x8] sm:$0xff] }
   0x2   :  { %v40_v2 = vsel %vm39_vm0, %v1788_v0, 0.0  ;;  %v49_v3 = vmul.f32 %v1788_v0, %v1788_v0  ;;  %v43_v4 = vsel %vm39_vm0, %v1793_v1, 0.0  ;;  %v50_v5 = vmul.f32 %v1793_v1, %v1793_v1 }
   0x3   :  { %41 = vadd.xlane.f32.xlu0 %v40_v2 }
   0x4   :  { %v51_v6 = vsel %vm39_vm0, %v49_v3, 0.0  ;;  %v54_v7 = vsel %vm39_vm0, %v50_v5, 0.0 }
   0x5   :  { %52 = vadd.xlane.f32.xlu1 %v51_v6 }
   0x7   :  { %44 = vadd.xlane.f32.xlu0 %v43_v4 }
   0x9   :  { %55 = vadd.xlane.f32.xlu1 %v54_v7 }
   0xa   :  { %13 = vsyncpa [#allocation4], 0  ;;  %v1642_v8 = vld [vmem:[%s2068_s2 + $0x8] sm:$0xff]   ;;  %v1722_v9 = vmov 0.0   ;;  %vm1723_vm1 = vmmov 0   ;;  %v1643_v10 = vld [vmem:[%s2068_s2] sm:$0xff]  }
   0xb   :  { %1484 = vmatprep.subr.bf16.mxu0 %v1722_v9  ;;  %1488 = vmatprep.mubr.msk.bf16.mxu0 %vm1723_vm1, %v1722_v9  ;;  %v1393_v28 = vld [vmem:[%s2067_s1] ss:$0 sm:$0xff]  ;;  %v1394_v33 = vld [vmem:[%s2067_s1 + $0x1] ss:$0 sm:$0xff]  ;;  %s1724_s17 = smov 96   ;;  %vm160_vm2 = vcmask 64512  }
   0xc   :  { %1485 = vmatpush3.bf16.msra.mxu0 %v1642_v8  ;;  %1504 = vmatprep.subr.bf16.mxu1 %v1722_v9  ;;  %v1395_v38 = vld [vmem:[%s2069_s3] ss:$0 sm:$0xff]  ;;  %s1725_s3 = smov 64   ;;  %s1726_s18 = smov 88   ;;  %vm285_vm3 = vcmask 1043456   ;;  %vm609_vm4 = vcmask 130112  }
   0xd   :  { %1486 = vmatprep.subr.bf16.mxu0 %v1722_v9  ;;  %1506 = vmatprep.mubr.msk.bf16.mxu1 %vm1723_vm1, %v1722_v9  ;;  %s1727_s19 = smov 120   ;;  %s1728_s20 = smov 56   ;;  %vm840_vm5 = vcmask 195712   ;;  %vm1071_vm6 = vcmask 261312  }
   0xe   :  { %s1729_s21 = smov 80   ;;  %s1730_s22 = smov 112  }
   0xf   :  { %s1731_s23 = smov 48   ;;  %s1732_s24 = smov 72  }
  0x10   :  { %1487 = vmatpush3.bf16.msra.mxu0 %v1643_v10  ;;  %s1733_s25 = smov 104   ;;  %s1734_s26 = smov 40  }
  0x11   :  { %1492 = vmatprep.subr.bf16.mxu0 %v1722_v9  ;;  %s1735_s27 = smov 8   ;;  %s1736_s28 = smov 16  }
  0x12   :  { %s1737_s10 = smov 24   ;;  %s1738_s2 = smov [#allocation3]  }
  0x13   :  { %s1382_s12 = sshll.u32 %s1738_s2, 4  ;;  %s1383_s12 = int_to_ptr.vmem [resolvable:$true] %s1382_s12 }
  0x14   :  { %s1700_s13 = scalar_lea.vmem %s1383_s12, 256  ;;  %p1705_p1 = scmp.lt.s32.totalorder %s1383_s12, %s1383_s12 }
  0x15   :  { %p1701_p0 = scmp.ne.s32.totalorder %s1383_s12, %s1700_s13  ;;  %p1706_p2 = scmp.lt.s32.totalorder %s1700_s13, %s1700_s13 }
  0x17   :  { %p1707_p3 = por %p1706_p2, %p1705_p1 }
  0x19   :  { %p1708_p4 = pnand %p1707_p3, %p1701_p0 }
  0x8c   :  { %v42_v11 = vpop.xlane.xlu0 %41 }
  0x8d   :  { %v47_v12 = vmul.f32 0.03125, %v42_v11 }
  0x8e   :  { %v53_v13 = vpop.xlane.xlu1 %52 }
  0x8f   :  { %v59_v14 = vmul.f32 %v47_v12, %v47_v12  ;;  %v57_v15 = vmul.f32 0.03125, %v53_v13  ;;  %v63_v25 = vsub.f32 %v1788_v0, %v47_v12 }
  0x90   :  { %v45_v16 = vpop.xlane.xlu0 %44 }
  0x91   :  { %v61_v17 = vsub.f32 %v57_v15, %v59_v14  ;;  %v48_v18 = vmul.f32 0.03125, %v45_v16 }
  0x92   :  { %v56_v19 = vpop.xlane.xlu1 %55 }
  0x93   :  { %v65_v20 = vadd.f32 1e-05, %v61_v17  ;;  %v60_v21 = vmul.f32 %v48_v18, %v48_v18  ;;  %v58_v22 = vmul.f32 0.03125, %v56_v19  ;;  %v64_v29 = vsub.f32 %v1793_v1, %v48_v18 }
  0x95   :  { %1656 = vrsqrt.f32 %v65_v20  ;;  %v62_v23 = vsub.f32 %v58_v22, %v60_v21 }
  0x97   :  { %v66_v24 = vadd.f32 1e-05, %v62_v23 }
  0x99   :  { %1658 = vrsqrt.f32 %v66_v24 }
  0xa2   :  { %v1657_v26 = vpop.eup %1656 }
  0xa3   :  { %v69_v27 = vmul.f32 %v1657_v26, %v63_v25 }
  0xa5   :  { %v75_v32 = vmul.f32 %v1393_v28, %v69_v27 }
  0xa6   :  { %v1659_v30 = vpop.eup %1658 }
  0xa7   :  { %v70_v31 = vmul.f32 %v1659_v30, %v64_v29  ;;  %v81_v35 = vadd.f32 %v1394_v33, %v75_v32 }
  0xa9   :  { %v76_v34 = vmul.f32 %v1393_v28, %v70_v31 }
  0xab   :  { %v82_v36 = vadd.f32 %v1394_v33, %v76_v34 }
  0xad   :  { %v83_v37 = vpack.c.bf16 %v82_v36, %v81_v35 }
  0xaf   :  { %1489 = vmatmul.mubr.msk.bf16.vlgmr.msra.gmra.mxu0 %vm39_vm0, %v83_v37 }
  0xb0   :  { %1494 = vmatprep.mubr.msk.bf16.mxu0 %vm1723_vm1, %v1722_v9 }
 0x16f   :  { %v144_v39 = vpop.f32.mrf.mxu0 }
 0x170   :  { %v145_v40 = vadd.f32 %v1395_v38, %v144_v39 }
 0x171   :  { %v1490_v41 = vpop.f32.mrf.mxu0 }
 0x172   :  { %v1833_v42 = vpack.c.bf16 %v145_v40, %v145_v40  ;;  %v151_v49 = vmul.f32 0.35355338, %v145_v40 }
 0x173   :  { %v147_v43 = vpop.f32.mrf.mxu0 }
 0x174   :  { %v148_v44 = vadd.f32 %v1395_v38, %v147_v43  ;;  %158 = vrot.lane.b32.xlu0 %v1833_v42, %s1724_s17  ;;  %v1841_v51 = vpack.c.bf16 %v151_v49, %v151_v49 }
 0x175   :  { %v1491_v45 = vpop.f32.mrf.mxu0 }
 0x176   :  { %v1836_v46 = vpack.c.bf16 %v148_v44, %v148_v44  ;;  %v152_v53 = vmul.f32 0.35355338, %v148_v44 }
 0x178   :  { %208 = vrot.lane.b32.xlu1 %v1836_v46, %s1724_s17  ;;  %v1849_v54 = vpack.c.bf16 %v152_v53, %v152_v53 }
 0x1e6   :  { %v159_v47 = vpop.permute.xlu0 %158 }
 0x1e7   :  { %v165_v48 = vsel %vm160_vm2, %v159_v47, 0 }
 0x1e8   :  { %1493 = vmatpush3.bf16.xpose.msra.mxu0 %v165_v48 }
 0x1e9   :  { %1498 = vmatprep.subr.bf16.mxu0 %v1722_v9 }
 0x1ea   :  { %v209_v50 = vpop.permute.xlu1 %208 }
 0x1eb   :  { %v214_v52 = vsel %vm160_vm2, %v209_v50, 0 }
 0x1ef   :  { %1495 = vmatmul.mubr.msk.bf16.vlgmr.msra.gmra.mxu0 %vm160_vm2, %v1841_v51 }
 0x1f0   :  { %1499 = vmatpush3.bf16.xpose.msra.mxu0 %v214_v52  ;;  %1500 = vmatprep.mubr.msk.bf16.mxu0 %vm1723_vm1, %v1722_v9 }
 0x1f1   :  { %1510 = vmatprep.subr.bf16.mxu0 %v1722_v9 }
 0x1f7   :  { %1501 = vmatmul.mubr.msk.bf16.vlgmr.msra.gmra.mxu0 %vm160_vm2, %v1849_v54 }
 0x1f8   :  { %1512 = vmatprep.mubr.msk.bf16.mxu0 %vm1723_vm1, %v1722_v9 }
 0x2af   :  { %v201_v55 = vpop.f32.mrf.mxu0 }
 0x2b0   :  { %v256_v56 = vsel %vm160_vm2, %v201_v55, -inf }
 0x2b1   :  { %257 = vmax.xlane.f32.xlu1 %v256_v56  ;;  %v1496_v57 = vpop.f32.mrf.mxu0 }
 0x2b3   :  { %v204_v58 = vpop.f32.mrf.mxu0 }
 0x2b5   :  { %v1497_v59 = vpop.f32.mrf.mxu0 }
 0x2b7   :  { %v250_v60 = vpop.f32.mrf.mxu0 }
 0x2b8   :  { %v259_v61 = vsel %vm160_vm2, %v250_v60, -inf }
 0x2b9   :  { %260 = vmax.xlane.f32.xlu0 %v259_v61  ;;  %v1502_v62 = vpop.f32.mrf.mxu0 }
 0x2bb   :  { %v253_v63 = vpop.f32.mrf.mxu0 }
 0x2bd   :  { %v1503_v2 = vpop.f32.mrf.mxu0 }
 0x2c2   :  { %329 = vrot.lane.b32.xlu1 %v1836_v46, %s1725_s3 }
 0x2c6   :  { %382 = vrot.lane.b32.xlu1 %v1833_v42, %s1726_s18 }
 0x33a   :  { %v258_v3 = vpop.xlane.xlu1 %257 }
 0x33b   :  { %v262_v4 = vsub.f32 %v201_v55, %v258_v3 }
 0x33d   :  { %v264_v5 = vmul.f32 1.442695, %v262_v4 }
 0x33e   :  { %v330_v6 = vpop.permute.xlu1 %329 }
 0x33f   :  { %1660 = vpow2.f32 %v264_v5  ;;  %v335_v7 = vsel %vm285_vm3, %v330_v6, 0 }
 0x340   :  { %1511 = vmatpush3.bf16.msra.mxu0 %v335_v7 }
 0x341   :  { %1522 = vmatprep.subr.bf16.mxu0 %v1722_v9 }
 0x342   :  { %v261_v8 = vpop.xlane.xlu0 %260  ;;  %v383_v17 = vpop.permute.xlu1 %382 }
 0x343   :  { %v263_v10 = vsub.f32 %v250_v60, %v261_v8  ;;  %v388_v24 = vsel %vm160_vm2, %v383_v17, 0 }
 0x345   :  { %v266_v11 = vmul.f32 1.442695, %v263_v10 }
 0x347   :  { %1662 = vpow2.f32 %v266_v11 }
 0x34c   :  { %v1661_v12 = vpop.eup %1660 }
 0x34d   :  { %v268_v13 = vsel %vm160_vm2, %v1661_v12, 0.0 }
 0x34e   :  { %269 = vadd.xlane.f32.xlu0 %v268_v13 }
 0x354   :  { %v1663_v14 = vpop.eup %1662 }
 0x355   :  { %v271_v15 = vsel %vm160_vm2, %v1663_v14, 0.0 }
 0x356   :  { %272 = vadd.xlane.f32.xlu1 %v271_v15 }
 0x364   :  { %280 = vrot.lane.b32.xlu0 %v1833_v42, %s1725_s3 }
 0x367   :  { %433 = vrot.lane.b32.xlu1 %v1836_v46, %s1726_s18 }
 0x368   :  { %380 = vrot.lane.b32.xlu0 %v1841_v51, %s1727_s19 }
 0x36b   :  { %431 = vrot.lane.b32.xlu1 %v1849_v54, %s1727_s19 }
 0x3d7   :  { %v270_v16 = vpop.xlane.xlu0 %269 }
 0x3d8   :  { %1664 = vrcp.f32 %v270_v16 }
 0x3db   :  { %v281_v18 = vpop.permute.xlu0 %280 }
 0x3dc   :  { %v287_v19 = vsel %vm285_vm3, %v281_v18, 0 }
 0x3dd   :  { %1505 = vmatpush3.bf16.msra.mxu1 %v287_v19 }
 0x3de   :  { %1516 = vmatprep.subr.bf16.mxu1 %v1722_v9 }
 0x3df   :  { %v273_v20 = vpop.xlane.xlu1 %272  ;;  %v381_v29 = vpop.permute.xlu0 %380 }
 0x3e0   :  { %1666 = vrcp.f32 %v273_v20 }
 0x3e3   :  { %v434_v27 = vpop.permute.xlu1 %433 }
 0x3e4   :  { %v439_v30 = vsel %vm160_vm2, %v434_v27, 0 }
 0x3e5   :  { %v1665_v21 = vpop.eup %1664 }
 0x3e6   :  { %v276_v22 = vmul.f32 %v1665_v21, %v1661_v12 }
 0x3e7   :  { %v432_v31 = vpop.permute.xlu1 %431 }
 0x3e8   :  { %v278_v23 = vpack.c.bf16 %v276_v22, %v276_v22 }
 0x3ea   :  { %1507 = vmatmul.mubr.msk.bf16.vlgmr.msra.gmra.mxu1 %vm160_vm2, %v278_v23 }
 0x3eb   :  { %1517 = vmatpush3.bf16.xpose.msra.mxu1 %v388_v24  ;;  %1518 = vmatprep.mubr.msk.bf16.mxu1 %vm1723_vm1, %v1722_v9 }
 0x3ec   :  { %1528 = vmatprep.subr.bf16.mxu1 %v1722_v9 }
 0x3ed   :  { %v1667_v25 = vpop.eup %1666 }
 0x3ee   :  { %v277_v26 = vmul.f32 %v1667_v25, %v1663_v14 }
 0x3f0   :  { %v279_v28 = vpack.c.bf16 %v277_v26, %v277_v26 }
 0x3f2   :  { %1513 = vmatmul.mubr.msk.bf16.vlgmr.msra.gmra.mxu0 %vm160_vm2, %v279_v28  ;;  %1519 = vmatmul.mubr.msk.bf16.vlgmr.msra.gmra.mxu1 %vm160_vm2, %v381_v29 }
 0x3f3   :  { %1523 = vmatpush3.bf16.xpose.msra.mxu0 %v439_v30  ;;  %1524 = vmatprep.mubr.msk.bf16.mxu0 %vm1723_vm1, %v1722_v9 }
 0x3f4   :  { %1534 = vmatprep.subr.bf16.mxu0 %v1722_v9  ;;  %1530 = vmatprep.mubr.msk.bf16.mxu1 %vm1723_vm1, %v1722_v9 }
 0x3fa   :  { %1525 = vmatmul.mubr.msk.bf16.vlgmr.msra.gmra.mxu0 %vm160_vm2, %v432_v31 }
 0x3fb   :  { %1536 = vmatprep.mubr.msk.bf16.mxu0 %vm1723_vm1, %v1722_v9 }
 0x4aa   :  { %v323_v32 = vpop.f32.mrf.mxu1 }
 0x4ab   :  { %377 = vst.msk [vmem:[#allocation2] sm:$0xff] %vm160_vm2, %v323_v32 }
 0x4ac   :  { %v1508_v33 = vpop.f32.mrf.mxu1 }
 0x4ae   :  { %v326_v34 = vpop.f32.mrf.mxu1 }
 0x4b0   :  { %v1509_v35 = vpop.f32.mrf.mxu1 }
 0x4b2   :  { %v371_v36 = vpop.f32.mrf.mxu0  ;;  %v424_v37 = vpop.f32.mrf.mxu1 }
 0x4b3   :  { %378 = vst.msk [vmem:[#allocation2 + $0x8] sm:$0xff] %vm160_vm2, %v371_v36  ;;  %v481_v38 = vsel %vm160_vm2, %v424_v37, -inf }
 0x4b4   :  { %482 = vmax.xlane.f32.xlu0 %v481_v38  ;;  %v1514_v39 = vpop.f32.mrf.mxu0  ;;  %v1520_v40 = vpop.f32.mrf.mxu1 }
 0x4b6   :  { %v374_v41 = vpop.f32.mrf.mxu0  ;;  %v427_v43 = vpop.f32.mrf.mxu1 }
 0x4b8   :  { %v1515_v44 = vpop.f32.mrf.mxu0  ;;  %v1521_v45 = vpop.f32.mrf.mxu1 }
 0x4ba   :  { %v475_v47 = vpop.f32.mrf.mxu0 }
 0x4bb   :  { %v484_v48 = vsel %vm160_vm2, %v475_v47, -inf }
 0x4bc   :  { %485 = vmax.xlane.f32.xlu1 %v484_v48  ;;  %v1526_v49 = vpop.f32.mrf.mxu0 }
 0x4be   :  { %v478_v50 = vpop.f32.mrf.mxu0 }
 0x4c0   :  { %v1527_v52 = vpop.f32.mrf.mxu0 }
 0x4cd   :  { %553 = vrot.lane.b32.xlu1 %v1836_v46, %s1728_s20 }
 0x4d1   :  { %614 = vrot.lane.b32.xlu1 %v1833_v42, %s1729_s21 }
 0x4d5   :  { %664 = vrot.lane.b32.xlu1 %v1836_v46, %s1729_s21 }
 0x4d9   :  { %662 = vrot.lane.b32.xlu1 %v1849_v54, %s1730_s22 }
 0x53d   :  { %v483_v53 = vpop.xlane.xlu0 %482 }
 0x53e   :  { %v487_v55 = vsub.f32 %v424_v37, %v483_v53 }
 0x540   :  { %v489_v56 = vmul.f32 1.442695, %v487_v55 }
 0x542   :  { %1668 = vpow2.f32 %v489_v56 }
 0x545   :  { %v486_v57 = vpop.xlane.xlu1 %485 }
 0x546   :  { %v488_v58 = vsub.f32 %v475_v47, %v486_v57 }
 0x548   :  { %v491_v59 = vmul.f32 1.442695, %v488_v58 }
 0x549   :  { %v554_v60 = vpop.permute.xlu1 %553 }
 0x54a   :  { %1670 = vpow2.f32 %v491_v59  ;;  %v559_v61 = vsel %vm285_vm3, %v554_v60, 0 }
 0x54b   :  { %1535 = vmatpush3.bf16.msra.mxu0 %v559_v61 }
 0x54c   :  { %1546 = vmatprep.subr.bf16.mxu0 %v1722_v9 }
 0x54d   :  { %v615_v11 = vpop.permute.xlu1 %614 }
 0x54e   :  { %v620_v13 = vsel %vm160_vm2, %v615_v11, 0 }
 0x54f   :  { %v1669_v62 = vpop.eup %1668 }
 0x550   :  { %v493_v63 = vsel %vm160_vm2, %v1669_v62, 0.0 }
 0x551   :  { %494 = vadd.xlane.f32.xlu0 %v493_v63  ;;  %v665_v16 = vpop.permute.xlu1 %664 }
 0x552   :  { %v670_v19 = vsel %vm160_vm2, %v665_v16, 0 }
 0x555   :  { %v663_v20 = vpop.permute.xlu1 %662 }
 0x557   :  { %v1671_v2 = vpop.eup %1670 }
 0x558   :  { %v496_v3 = vsel %vm160_vm2, %v1671_v2, 0.0 }
 0x559   :  { %497 = vadd.xlane.f32.xlu0 %v496_v3 }
 0x56f   :  { %505 = vrot.lane.b32.xlu0 %v1833_v42, %s1728_s20 }
 0x573   :  { %612 = vrot.lane.b32.xlu0 %v1841_v51, %s1730_s22 }
 0x5da   :  { %v495_v4 = vpop.xlane.xlu0 %494 }
 0x5db   :  { %1672 = vrcp.f32 %v495_v4 }
 0x5e2   :  { %v498_v5 = vpop.xlane.xlu0 %497 }
 0x5e3   :  { %1674 = vrcp.f32 %v498_v5 }
 0x5e6   :  { %v506_v6 = vpop.permute.xlu0 %505 }
 0x5e7   :  { %v511_v7 = vsel %vm285_vm3, %v506_v6, 0 }
 0x5e8   :  { %v1673_v8 = vpop.eup %1672  ;;  %1529 = vmatpush3.bf16.msra.mxu1 %v511_v7 }
 0x5e9   :  { %1540 = vmatprep.subr.bf16.mxu1 %v1722_v9  ;;  %v501_v10 = vmul.f32 %v1673_v8, %v1669_v62 }
 0x5ea   :  { %v613_v18 = vpop.permute.xlu0 %612 }
 0x5eb   :  { %v503_v12 = vpack.c.bf16 %v501_v10, %v501_v10 }
 0x5ed   :  { %1531 = vmatmul.mubr.msk.bf16.vlgmr.msra.gmra.mxu1 %vm160_vm2, %v503_v12 }
 0x5ee   :  { %1541 = vmatpush3.bf16.xpose.msra.mxu1 %v620_v13  ;;  %1542 = vmatprep.mubr.msk.bf16.mxu1 %vm1723_vm1, %v1722_v9 }
 0x5ef   :  { %1552 = vmatprep.subr.bf16.mxu1 %v1722_v9 }
 0x5f0   :  { %v1675_v14 = vpop.eup %1674 }
 0x5f1   :  { %v502_v15 = vmul.f32 %v1675_v14, %v1671_v2 }
 0x5f3   :  { %v504_v17 = vpack.c.bf16 %v502_v15, %v502_v15 }
 0x5f5   :  { %1537 = vmatmul.mubr.msk.bf16.vlgmr.msra.gmra.mxu0 %vm160_vm2, %v504_v17  ;;  %1543 = vmatmul.mubr.msk.bf16.vlgmr.msra.gmra.mxu1 %vm160_vm2, %v613_v18 }
 0x5f6   :  { %1547 = vmatpush3.bf16.xpose.msra.mxu0 %v670_v19  ;;  %1548 = vmatprep.mubr.msk.bf16.mxu0 %vm1723_vm1, %v1722_v9 }
 0x5f7   :  { %1558 = vmatprep.subr.bf16.mxu0 %v1722_v9  ;;  %1554 = vmatprep.mubr.msk.bf16.mxu1 %vm1723_vm1, %v1722_v9 }
 0x5fd   :  { %1549 = vmatmul.mubr.msk.bf16.vlgmr.msra.gmra.mxu0 %vm160_vm2, %v663_v20 }
 0x5fe   :  { %1560 = vmatprep.mubr.msk.bf16.mxu0 %vm1723_vm1, %v1722_v9 }
 0x6ad   :  { %v1917_v21 = vpop.f32.mrf.mxu1 }
 0x6af   :  { %v1532_v22 = vpop.f32.mrf.mxu1 }
 0x6b1   :  { %v550_v23 = vpop.f32.mrf.mxu1 }
 0x6b3   :  { %v1533_v24 = vpop.f32.mrf.mxu1 }
 0x6b5   :  { %v1919_v25 = vpop.f32.mrf.mxu0  ;;  %v656_v26 = vpop.f32.mrf.mxu1 }
 0x6b6   :  { %v712_v27 = vsel %vm160_vm2, %v656_v26, -inf }
 0x6b7   :  { %713 = vmax.xlane.f32.xlu0 %v712_v27  ;;  %v1538_v28 = vpop.f32.mrf.mxu0  ;;  %v1544_v29 = vpop.f32.mrf.mxu1 }
 0x6b9   :  { %v598_v30 = vpop.f32.mrf.mxu0  ;;  %v659_v31 = vpop.f32.mrf.mxu1 }
 0x6bb   :  { %v1539_v32 = vpop.f32.mrf.mxu0  ;;  %v1545_v33 = vpop.f32.mrf.mxu1 }
 0x6bd   :  { %v706_v34 = vpop.f32.mrf.mxu0 }
 0x6be   :  { %v715_v35 = vsel %vm160_vm2, %v706_v34, -inf }
 0x6bf   :  { %716 = vmax.xlane.f32.xlu1 %v715_v35  ;;  %v1550_v36 = vpop.f32.mrf.mxu0 }
 0x6c1   :  { %v709_v37 = vpop.f32.mrf.mxu0 }
 0x6c3   :  { %v1551_v38 = vpop.f32.mrf.mxu0 }
 0x6d0   :  { %784 = vrot.lane.b32.xlu1 %v1836_v46, %s1731_s23 }
 0x6d4   :  { %845 = vrot.lane.b32.xlu1 %v1833_v42, %s1732_s24 }
 0x6d8   :  { %895 = vrot.lane.b32.xlu1 %v1836_v46, %s1732_s24 }
 0x6dc   :  { %893 = vrot.lane.b32.xlu1 %v1849_v54, %s1733_s25 }
 0x740   :  { %v714_v39 = vpop.xlane.xlu0 %713 }
 0x741   :  { %v718_v40 = vsub.f32 %v656_v26, %v714_v39 }
 0x743   :  { %v720_v41 = vmul.f32 1.442695, %v718_v40 }
 0x745   :  { %1676 = vpow2.f32 %v720_v41 }
 0x748   :  { %v717_v43 = vpop.xlane.xlu1 %716 }
 0x749   :  { %v719_v44 = vsub.f32 %v706_v34, %v717_v43 }
 0x74b   :  { %v722_v45 = vmul.f32 1.442695, %v719_v44 }
 0x74c   :  { %v785_v47 = vpop.permute.xlu1 %784 }
 0x74d   :  { %1678 = vpow2.f32 %v722_v45  ;;  %v790_v48 = vsel %vm285_vm3, %v785_v47, 0 }
 0x74e   :  { %1559 = vmatpush3.bf16.msra.mxu0 %v790_v48 }
 0x74f   :  { %1570 = vmatprep.subr.bf16.mxu0 %v1722_v9 }
 0x750   :  { %v846_v60 = vpop.permute.xlu1 %845 }
 0x751   :  { %v851_v62 = vsel %vm160_vm2, %v846_v60, 0 }
 0x752   :  { %v1677_v49 = vpop.eup %1676 }
 0x753   :  { %v724_v50 = vsel %vm160_vm2, %v1677_v49, 0.0 }
 0x754   :  { %725 = vadd.xlane.f32.xlu0 %v724_v50  ;;  %v896_v2 = vpop.permute.xlu1 %895 }
 0x755   :  { %v901_v5 = vsel %vm160_vm2, %v896_v2, 0 }
 0x758   :  { %v894_v6 = vpop.permute.xlu1 %893 }
 0x75a   :  { %v1679_v52 = vpop.eup %1678 }
 0x75b   :  { %v727_v54 = vsel %vm160_vm2, %v1679_v52, 0.0 }
 0x75c   :  { %728 = vadd.xlane.f32.xlu0 %v727_v54  ;;  %v1644_v54 = vld [vmem:[%s2070_s4 + $0x8] sm:$0xff]  }
 0x772   :  { %736 = vrot.lane.b32.xlu0 %v1833_v42, %s1731_s23 }
 0x776   :  { %843 = vrot.lane.b32.xlu0 %v1841_v51, %s1733_s25 }
 0x7dd   :  { %v726_v53 = vpop.xlane.xlu0 %725 }
 0x7de   :  { %1680 = vrcp.f32 %v726_v53  ;;  %v1645_v53 = vld [vmem:[%s2070_s4] sm:$0xff]  }
 0x7e5   :  { %v729_v55 = vpop.xlane.xlu0 %728 }
 0x7e6   :  { %1682 = vrcp.f32 %v729_v55 }
 0x7e9   :  { %v737_v56 = vpop.permute.xlu0 %736 }
 0x7ea   :  { %v742_v57 = vsel %vm285_vm3, %v737_v56, 0 }
 0x7eb   :  { %v1681_v58 = vpop.eup %1680  ;;  %1553 = vmatpush3.bf16.msra.mxu1 %v742_v57 }
 0x7ec   :  { %1564 = vmatprep.subr.bf16.mxu1 %v1722_v9  ;;  %v732_v59 = vmul.f32 %v1681_v58, %v1677_v49 }
 0x7ed   :  { %v844_v4 = vpop.permute.xlu0 %843 }
 0x7ee   :  { %v734_v61 = vpack.c.bf16 %v732_v59, %v732_v59 }
 0x7f0   :  { %1555 = vmatmul.mubr.msk.bf16.vlgmr.msra.gmra.mxu1 %vm160_vm2, %v734_v61 }
 0x7f1   :  { %1565 = vmatpush3.bf16.xpose.msra.mxu1 %v851_v62  ;;  %1566 = vmatprep.mubr.msk.bf16.mxu1 %vm1723_vm1, %v1722_v9 }
 0x7f2   :  { %1576 = vmatprep.subr.bf16.mxu1 %v1722_v9 }
 0x7f3   :  { %v1683_v51 = vpop.eup %1682 }
 0x7f4   :  { %v733_v63 = vmul.f32 %v1683_v51, %v1679_v52 }
 0x7f6   :  { %v735_v3 = vpack.c.bf16 %v733_v63, %v733_v63 }
 0x7f8   :  { %1561 = vmatmul.mubr.msk.bf16.vlgmr.msra.gmra.mxu0 %vm160_vm2, %v735_v3  ;;  %1567 = vmatmul.mubr.msk.bf16.vlgmr.msra.gmra.mxu1 %vm160_vm2, %v844_v4 }
 0x7f9   :  { %1571 = vmatpush3.bf16.xpose.msra.mxu0 %v901_v5  ;;  %1572 = vmatprep.mubr.msk.bf16.mxu0 %vm1723_vm1, %v1722_v9  ;;  %v1415_v5 = vld [vmem:[%s2067_s1 + $0x4] ss:$0 sm:$0xff] }
 0x7fa   :  { %1582 = vmatprep.subr.bf16.mxu0 %v1722_v9  ;;  %1578 = vmatprep.mubr.msk.bf16.mxu1 %vm1723_vm1, %v1722_v9 }
 0x800   :  { %1573 = vmatmul.mubr.msk.bf16.vlgmr.msra.gmra.mxu0 %vm160_vm2, %v894_v6 }
 0x801   :  { %1584 = vmatprep.mubr.msk.bf16.mxu0 %vm1723_vm1, %v1722_v9 }
 0x8b0   :  { %v778_v7 = vpop.f32.mrf.mxu1 }
 0x8b2   :  { %v1556_v8 = vpop.f32.mrf.mxu1 }
 0x8b4   :  { %v781_v10 = vpop.f32.mrf.mxu1 }
 0x8b6   :  { %v1557_v11 = vpop.f32.mrf.mxu1 }
 0x8b8   :  { %v826_v12 = vpop.f32.mrf.mxu0  ;;  %v887_v13 = vpop.f32.mrf.mxu1 }
 0x8b9   :  { %v943_v14 = vsel %vm160_vm2, %v887_v13, -inf }
 0x8ba   :  { %944 = vmax.xlane.f32.xlu0 %v943_v14  ;;  %v1562_v15 = vpop.f32.mrf.mxu0  ;;  %v1568_v16 = vpop.f32.mrf.mxu1 }
 0x8bc   :  { %v829_v17 = vpop.f32.mrf.mxu0  ;;  %v890_v18 = vpop.f32.mrf.mxu1 }
 0x8be   :  { %v1563_v19 = vpop.f32.mrf.mxu0  ;;  %v1569_v20 = vpop.f32.mrf.mxu1 }
 0x8bf   :  { %v1646_v20 = vld [vmem:[%s2071_s5 + $0x8] sm:$0xff]  }
 0x8c0   :  { %v937_v22 = vpop.f32.mrf.mxu0 }
 0x8c1   :  { %v946_v23 = vsel %vm160_vm2, %v937_v22, -inf }
 0x8c2   :  { %947 = vmax.xlane.f32.xlu1 %v946_v23  ;;  %v1574_v24 = vpop.f32.mrf.mxu0 }
 0x8c4   :  { %v940_v26 = vpop.f32.mrf.mxu0 }
 0x8c6   :  { %v1575_v27 = vpop.f32.mrf.mxu0 }
 0x8d3   :  { %1015 = vrot.lane.b32.xlu1 %v1836_v46, %s1734_s26 }
 0x8d7   :  { %603 = vrot.lane.b32.xlu1 %v1917_v21, %s1735_s27 }
 0x8db   :  { %605 = vrot.lane.b32.xlu1 %v1919_v25, %s1735_s27 }
 0x8df   :  { %836 = vrot.lane.b32.xlu1 %v826_v12, %s1736_s28 }
 0x943   :  { %v945_v28 = vpop.xlane.xlu0 %944 }
 0x944   :  { %v949_v29 = vsub.f32 %v887_v13, %v945_v28 }
 0x946   :  { %v951_v30 = vmul.f32 1.442695, %v949_v29 }
 0x948   :  { %1684 = vpow2.f32 %v951_v30 }
 0x94b   :  { %v948_v31 = vpop.xlane.xlu1 %947 }
 0x94c   :  { %v950_v32 = vsub.f32 %v937_v22, %v948_v31  ;;  %v1648_v22 = vld [vmem:[%s2073_s7 + $0x38] sm:$0xff]  }
 0x94e   :  { %v953_v33 = vmul.f32 1.442695, %v950_v32 }
 0x94f   :  { %v1016_v34 = vpop.permute.xlu1 %1015 }
 0x950   :  { %1686 = vpow2.f32 %v953_v33  ;;  %v1021_v46 = vsel %vm285_vm3, %v1016_v34, 0 }
 0x951   :  { %1583 = vmatpush3.bf16.msra.mxu0 %v1021_v46 }
 0x952   :  { %1596 = vmatprep.subr.bf16.mxu0 %v1722_v9 }
 0x953   :  { %v604_v21 = vpop.permute.xlu1 %603 }
 0x954   :  { %610 = vst.msk [vmem:[#allocation2] sm:$0xff] %vm609_vm4, %v604_v21 }
 0x955   :  { %v1685_v25 = vpop.eup %1684 }
 0x956   :  { %v955_v35 = vsel %vm160_vm2, %v1685_v25, 0.0 }
 0x957   :  { %956 = vadd.xlane.f32.xlu0 %v955_v35  ;;  %v606_v36 = vpop.permute.xlu1 %605 }
 0x958   :  { %611 = vst.msk [vmem:[#allocation2 + $0x8] sm:$0xff] %vm609_vm4, %v606_v36 }
 0x95b   :  { %v837_v37 = vpop.permute.xlu1 %836 }
 0x95c   :  { %842 = vst.msk [vmem:[#allocation2 + $0x8] sm:$0xff] %vm840_vm5, %v837_v37 }
 0x95d   :  { %v1687_v38 = vpop.eup %1686 }
 0x95e   :  { %v958_v39 = vsel %vm160_vm2, %v1687_v38, 0.0 }
 0x95f   :  { %959 = vadd.xlane.f32.xlu0 %v958_v39 }
 0x975   :  { %967 = vrot.lane.b32.xlu0 %v1833_v42, %s1734_s26 }
 0x979   :  { %834 = vrot.lane.b32.xlu0 %v778_v7, %s1736_s28 }
 0x9e0   :  { %v957_v40 = vpop.xlane.xlu0 %956 }
 0x9e1   :  { %1688 = vrcp.f32 %v957_v40 }
 0x9e8   :  { %v960_v41 = vpop.xlane.xlu0 %959 }
 0x9e9   :  { %1690 = vrcp.f32 %v960_v41 }
 0x9ec   :  { %v968_v43 = vpop.permute.xlu0 %967 }
 0x9ed   :  { %v973_v44 = vsel %vm285_vm3, %v968_v43, 0 }
 0x9ee   :  { %v1689_v45 = vpop.eup %1688  ;;  %1577 = vmatpush3.bf16.msra.mxu1 %v973_v44  ;;  %v1420_v44 = vld [vmem:[%s2067_s1 + $0x3] ss:$0 sm:$0xff] }
 0x9ef   :  { %v963_v47 = vmul.f32 %v1689_v45, %v1685_v25  ;;  %1588 = vmatprep.subr.bf16.mxu1 %v1722_v9 }
 0x9f0   :  { %v835_v48 = vpop.permute.xlu0 %834 }
 0x9f1   :  { %841 = vst.msk [vmem:[#allocation2] sm:$0xff] %vm840_vm5, %v835_v48  ;;  %v965_v49 = vpack.c.bf16 %v963_v47, %v963_v47 }
 0x9f3   :  { %1579 = vmatmul.mubr.msk.bf16.vlgmr.msra.gmra.mxu1 %vm160_vm2, %v965_v49 }
 0x9f4   :  { %1592 = vmatprep.mubr.msk.bf16.mxu1 %vm1723_vm1, %v1722_v9  ;;  %1589 = vmatpush3.bf16.msra.mxu1 %v1644_v54  ;;  %v1652_v54 = vld [vmem:[%s2073_s7 + $0x18] sm:$0xff]  }
 0x9f5   :  { %1590 = vmatprep.subr.bf16.mxu1 %v1722_v9 }
 0x9f6   :  { %v1691_v42 = vpop.eup %1690 }
 0x9f7   :  { %v964_v50 = vmul.f32 %v1691_v42, %v1687_v38  ;;  %v1419_v38 = vld [vmem:[%s2067_s1 + $0x2] ss:$0 sm:$0xff]  ;;  %v1649_v42 = vld [vmem:[%s2073_s7 + $0x30] sm:$0xff]  }
 0x9f8   :  { %1591 = vmatpush3.bf16.msra.mxu1 %v1645_v53  ;;  %v1653_v53 = vld [vmem:[%s2073_s7 + $0x10] sm:$0xff]  }
 0x9f9   :  { %v966_v52 = vpack.c.bf16 %v964_v50, %v964_v50  ;;  %1604 = vmatprep.subr.bf16.mxu1 %v1722_v9  ;;  %v1650_v50 = vld [vmem:[%s2073_s7 + $0x28] sm:$0xff]  }
 0x9fb   :  { %1585 = vmatmul.mubr.msk.bf16.vlgmr.msra.gmra.mxu0 %vm160_vm2, %v966_v52  ;;  %v1651_v52 = vld [vmem:[%s2073_s7 + $0x20] sm:$0xff]  }
 0x9fc   :  { %1600 = vmatprep.mubr.msk.bf16.mxu0 %vm1723_vm1, %v1722_v9  ;;  %1597 = vmatpush3.bf16.msra.mxu0 %v1646_v20 }
 0x9fd   :  { %1598 = vmatprep.subr.bf16.mxu0 %v1722_v9 }
 0xab3   :  { %v1009_v55 = vpop.f32.mrf.mxu1 }
 0xab4   :  { %1065 = vrot.lane.b32.xlu0 %v1009_v55, %s1737_s10  ;;  %v1654_v55 = vld [vmem:[%s2073_s7 + $0x8] sm:$0xff]  }
 0xab5   :  { %v1580_v56 = vpop.f32.mrf.mxu1 }
 0xab6   :  { %v1655_v56 = vld [vmem:[%s2073_s7] sm:$0xff]  }
 0xab7   :  { %v1012_v57 = vpop.f32.mrf.mxu1 }
 0xab8   :  { %v1421_v57 = vld [vmem:[%s2072_s6] ss:$0 sm:$0xff] }
 0xab9   :  { %v1581_v58 = vpop.f32.mrf.mxu1 }
 0xabb   :  { %v1057_v59 = vpop.f32.mrf.mxu0 }
 0xabc   :  { %1067 = vrot.lane.b32.xlu1 %v1057_v59, %s1737_s10 }
 0xabd   :  { %v1586_v60 = vpop.f32.mrf.mxu0 }
 0xabf   :  { %v1060_v61 = vpop.f32.mrf.mxu0 }
 0xac1   :  { %v1587_v62 = vpop.f32.mrf.mxu0 }
 0xb26   :  { %v1066_v51 = vpop.permute.xlu0 %1065 }
 0xb27   :  { %1072 = vst.msk [vmem:[#allocation2] sm:$0xff] %vm1071_vm6, %v1066_v51 }
 0xb2e   :  { %v1068_v63 = vpop.permute.xlu1 %1067  ;;  %v1074_v2 = vld [vmem:[#allocation2] sm:$0xff] }
 0xb2f   :  { %1073 = vst.msk [vmem:[#allocation2 + $0x8] sm:$0xff] %vm1071_vm6, %v1068_v63 }
 0xb36   :  { %v1075_v3 = vld [vmem:[#allocation2 + $0x8] sm:$0xff] }
 0xb37   :  { %v1076_v4 = vpack.c.bf16 %v1075_v3, %v1074_v2 }
 0xb39   :  { %1593 = vmatmul.mubr.msk.bf16.vlgmr.msra.gmra.mxu1 %vm39_vm0, %v1076_v4 }
 0xb3a   :  { %1620 = vmatprep.mubr.msk.bf16.mxu1 %vm1723_vm1, %v1722_v9  ;;  %1605 = vmatpush3.bf16.msra.mxu1 %v1648_v22 }
 0xb3b   :  { %1606 = vmatprep.subr.bf16.mxu1 %v1722_v9 }
 0xb3e   :  { %1607 = vmatpush3.bf16.msra.mxu1 %v1649_v42 }
 0xb3f   :  { %1608 = vmatprep.subr.bf16.mxu1 %v1722_v9 }
 0xb42   :  { %1609 = vmatpush3.bf16.msra.mxu1 %v1650_v50 }
 0xb43   :  { %1610 = vmatprep.subr.bf16.mxu1 %v1722_v9 }
 0xb46   :  { %1611 = vmatpush3.bf16.msra.mxu1 %v1651_v52 }
 0xb47   :  { %1612 = vmatprep.subr.bf16.mxu1 %v1722_v9 }
 0xb4a   :  { %1613 = vmatpush3.bf16.msra.mxu1 %v1652_v54 }
 0xb4b   :  { %1614 = vmatprep.subr.bf16.mxu1 %v1722_v9 }
 0xb4e   :  { %1615 = vmatpush3.bf16.msra.mxu1 %v1653_v53 }
 0xb4f   :  { %1616 = vmatprep.subr.bf16.mxu1 %v1722_v9 }
 0xb52   :  { %1617 = vmatpush3.bf16.msra.mxu1 %v1654_v55 }
 0xb53   :  { %1618 = vmatprep.subr.bf16.mxu1 %v1722_v9 }
 0xb56   :  { %1619 = vmatpush3.bf16.msra.mxu1 %v1655_v56 }
 0xbf9   :  { %v1134_v6 = vpop.f32.mrf.mxu1 }
 0xbfa   :  { %v1135_v7 = vadd.f32 %v1415_v5, %v1134_v6 }
 0xbfb   :  { %v1594_v8 = vpop.f32.mrf.mxu1 }
 0xbfc   :  { %v1990_v10 = vadd.f32 %v1135_v7, %v1788_v0 }
 0xbfd   :  { %v1137_v11 = vpop.f32.mrf.mxu1 }
 0xbfe   :  { %v1138_v12 = vadd.f32 %v1415_v5, %v1137_v11  ;;  %v1143_v13 = vsel %vm39_vm0, %v1990_v10, 0.0  ;;  %v1151_v14 = vmul.f32 %v1990_v10, %v1990_v10 }
 0xbff   :  { %1144 = vadd.xlane.f32.xlu0 %v1143_v13  ;;  %v1595_v15 = vpop.f32.mrf.mxu1  ;;  %v1425_v13 = vld [vmem:[%s2067_s1 + $0x5] ss:$0 sm:$0xff] }
 0xc00   :  { %v1997_v16 = vadd.f32 %v1138_v12, %v1793_v1  ;;  %v1153_v17 = vsel %vm39_vm0, %v1151_v14, 0.0  ;;  %v1647_v1 = vld [vmem:[%s2071_s5] sm:$0xff]  }
 0xc01   :  { %1599 = vmatpush3.bf16.msra.mxu0 %v1647_v1 }
 0xc02   :  { %v1146_v18 = vsel %vm39_vm0, %v1997_v16, 0.0  ;;  %v1152_v0 = vmul.f32 %v1997_v16, %v1997_v16 }
 0xc03   :  { %1154 = vadd.xlane.f32.xlu0 %v1153_v17  ;;  %1147 = vadd.xlane.f32.xlu1 %v1146_v18 }
 0xc04   :  { %v1156_v19 = vsel %vm39_vm0, %v1152_v0, 0.0 }
 0xc07   :  { %1157 = vadd.xlane.f32.xlu0 %v1156_v19 }
 0xc88   :  { %v1145_v23 = vpop.xlane.xlu0 %1144 }
 0xc89   :  { %v1149_v24 = vmul.f32 0.03125, %v1145_v23 }
 0xc8b   :  { %v1161_v28 = vmul.f32 %v1149_v24, %v1149_v24  ;;  %v1165_v35 = vsub.f32 %v1990_v10, %v1149_v24 }
 0xc8c   :  { %v1155_v26 = vpop.xlane.xlu0 %1154  ;;  %v1148_v27 = vpop.xlane.xlu1 %1147 }
 0xc8d   :  { %v1159_v29 = vmul.f32 0.03125, %v1155_v26  ;;  %v1150_v30 = vmul.f32 0.03125, %v1148_v27 }
 0xc8f   :  { %v1163_v31 = vsub.f32 %v1159_v29, %v1161_v28  ;;  %v1162_v34 = vmul.f32 %v1150_v30, %v1150_v30  ;;  %v1166_v39 = vsub.f32 %v1997_v16, %v1150_v30 }
 0xc90   :  { %v1158_v32 = vpop.xlane.xlu0 %1157 }
 0xc91   :  { %v1167_v33 = vadd.f32 1e-05, %v1163_v31  ;;  %v1160_v46 = vmul.f32 0.03125, %v1158_v32 }
 0xc93   :  { %1692 = vrsqrt.f32 %v1167_v33  ;;  %v1164_v21 = vsub.f32 %v1160_v46, %v1162_v34 }
 0xc95   :  { %v1168_v25 = vadd.f32 1e-05, %v1164_v21 }
 0xc97   :  { %1694 = vrsqrt.f32 %v1168_v25 }
 0xca0   :  { %v1693_v36 = vpop.eup %1692 }
 0xca1   :  { %v1171_v37 = vmul.f32 %v1693_v36, %v1165_v35 }
 0xca3   :  { %v1177_v43 = vmul.f32 %v1419_v38, %v1171_v37 }
 0xca4   :  { %v1695_v40 = vpop.eup %1694 }
 0xca5   :  { %v1172_v41 = vmul.f32 %v1695_v40, %v1166_v39  ;;  %v1183_v47 = vadd.f32 %v1420_v44, %v1177_v43 }
 0xca7   :  { %v1178_v45 = vmul.f32 %v1419_v38, %v1172_v41 }
 0xca9   :  { %v1184_v48 = vadd.f32 %v1420_v44, %v1178_v45 }
 0xcab   :  { %v1185_v49 = vpack.c.bf16 %v1184_v48, %v1183_v47 }
 0xcad   :  { %1601 = vmatmul.mubr.msk.bf16.vlgmr.msra.gmra.mxu0 %vm39_vm0, %v1185_v49 }
 0xd6d   :  { %v1246_v58 = vpop.f32.mrf.mxu0 }
 0xd6e   :  { %v1247_v59 = vadd.f32 %v1421_v57, %v1246_v58 }
 0xd6f   :  { %v1602_v60 = vpop.f32.mrf.mxu0 }
 0xd70   :  { %v1255_v61 = vmul.f32 0.70710677, %v1247_v59  ;;  %v1253_v5 = vmul.f32 0.5, %v1247_v59 }
 0xd71   :  { %v1249_v62 = vpop.f32.mrf.mxu0 }
 0xd72   :  { %1696 = verf.f32 %v1255_v61  ;;  %v1250_v51 = vadd.f32 %v1421_v57, %v1249_v62 }
 0xd73   :  { %v1603_v63 = vpop.f32.mrf.mxu0 }
 0xd74   :  { %v1256_v2 = vmul.f32 0.70710677, %v1250_v51  ;;  %v1254_v6 = vmul.f32 0.5, %v1250_v51 }
 0xd76   :  { %1698 = verf.f32 %v1256_v2 }
 0xd7f   :  { %v1697_v9 = vpop.eup %1696 }
 0xd80   :  { %v1259_v3 = vadd.f32 1.0, %v1697_v9 }
 0xd82   :  { %v1261_v8 = vmul.f32 %v1259_v3, %v1253_v5 }
 0xd83   :  { %v1699_v4 = vpop.eup %1698 }
 0xd84   :  { %v1260_v7 = vadd.f32 1.0, %v1699_v4 }
 0xd86   :  { %v1262_v11 = vmul.f32 %v1260_v7, %v1254_v6 }
 0xd88   :  { %v1263_v12 = vpack.c.bf16 %v1262_v11, %v1261_v8 }
 0xd8a   :  { %1621 = vmatmul.mubr.bf16.vlgmr.msra.gmra.mxu1 %v1263_v12 }
 0xe4a   :  { %v1366_v14 = vpop.f32.mrf.mxu1 }
 0xe4b   :  { %v1367_v15 = vadd.f32 %v1425_v13, %v1366_v14 }
 0xe4c   :  { %v1622_v17 = vpop.f32.mrf.mxu1 }
 0xe4d   :  { %v1373_v18 = vadd.f32 %v1367_v15, %v1990_v10 }
 0xe4e   :  { %v1369_v0 = vpop.f32.mrf.mxu1 }
 0xe4f   :  { %1375 = vst.msk [vmem:[#allocation3] sm:$0xff] %vm39_vm0, %v1373_v18  ;;  %v1370_v19 = vadd.f32 %v1425_v13, %v1369_v0 }
 0xe50   :  { %v1623_v20 = vpop.f32.mrf.mxu1 }
 0xe51   :  { %v1374_v1 = vadd.f32 %v1370_v19, %v1997_v16 }
 0xe53   :  { %1376 = vst.msk [vmem:[#allocation3 + $0x8] sm:$0xff] %vm39_vm0, %v1374_v1 }
 0xe54   :  { %1711 = shalt.err (!%p1708_p4)
}
 0xe55   :  { %s1739_s1 = smov 128  }
 0xe56   :  { %1388 = dma.vmem_to_hbm [thread:$0]  %s1383_s12, 256, %s2074_s8, [#allocation4], %s1739_s1, %s1739_s1, %s1735_s27  }
 0xe57   :  { %1720 = dma.done.wait [#allocation4], 256  }
 0xe58   :  { %1721 = vsyncadd [#allocation4], 4294967040 }
 0xe59   :  { %1392 = vsyncpa [#allocation4], 1 }

</bundles_post_ra>
